<compile_context>
chip_gen: v7x
topology: tpu7x:2x2x1
jax: 0.10.0
libtpu: 0.0.40
codegen_flags: <defaults>
</compile_context>

<pallas_src>
import functools

import numpy as np
import jax
import jax.numpy as jnp
from jax import lax
from jax.experimental import pallas as pl
from jax.experimental.pallas import tpu as pltpu

LANE = 128
KSZ = 5          # conv kernel size
H_IN = 28        # required input spatial size (so the flatten width is 320)
H1, P1 = 24, 12  # conv1 output / pool1 output spatial size
H2, P2 = 8, 4    # conv2 output / pool2 output spatial size


def _pad_to_lane(n):
    return max(LANE, ((n + LANE - 1) // LANE) * LANE)


# ----------------------------------------------------------------------------
# Fused kernel
# ----------------------------------------------------------------------------
def _pool_rows(y, n_pairs, tb):
    """Max over adjacent row blocks: rows (oh*tb + b) -> rows (ph*tb + b)."""
    parts = [jnp.maximum(y[(2 * p) * tb:(2 * p + 1) * tb, :],
                         y[(2 * p + 1) * tb:(2 * p + 2) * tb, :])
             for p in range(n_pairs)]
    return jnp.concatenate(parts, axis=0)


def _cnn_fused_kernel(x_ref, w1_ref, b1_ref, w2_ref, b2_ref,
                      wf1_ref, bf1_ref, wf2_ref, bf2_ref, o_ref, *, tb):
    x2d = x_ref[0]                                      # (28*tb, 28*Cin)

    # ---- conv1: 5 banded matmuls (one per kernel row) + bias, pool, relu ----
    y1 = None
    for kh in range(KSZ):
        xs = x2d[kh * tb: kh * tb + H1 * tb, :]         # (24*tb, 28*Cin)
        t = jnp.dot(xs, w1_ref[kh], preferred_element_type=jnp.float32)
        y1 = t if y1 is None else y1 + t
    y1 = y1 + b1_ref[...]                               # (24*tb, 256)
    wp1 = jnp.maximum(y1[:, :LANE], y1[:, LANE:])       # width pool  (24*tb, 128)
    p1 = jnp.maximum(_pool_rows(wp1, P1, tb), 0.0)      # height pool + relu (12*tb, 128)

    # ---- conv2 ----
    # TODO(synk): training-mode nn.Dropout2d channel masking not implemented (eval identity).
    y2 = None
    for kh in range(KSZ):
        ps = p1[kh * tb: kh * tb + H2 * tb, :]          # (8*tb, 128)
        t = jnp.dot(ps, w2_ref[kh], preferred_element_type=jnp.float32)
        y2 = t if y2 is None else y2 + t
    y2 = y2 + b2_ref[...]                               # (8*tb, 256)
    wp2 = jnp.maximum(y2[:, :LANE], y2[:, LANE:])       # (8*tb, 128)
    p2 = jnp.maximum(_pool_rows(wp2, P2, tb), 0.0)      # (4*tb, 128)

    # ---- fc1 (PyTorch flatten order folded into wf1, padded to 128 lanes) + relu ----
    h = None
    for ph in range(P2):
        s = p2[ph * tb:(ph + 1) * tb, :]                # (tb, 128)
        t = jnp.dot(s, wf1_ref[ph], preferred_element_type=jnp.float32)
        h = t if h is None else h + t
    h = jnp.maximum(h + bf1_ref[...], 0.0)              # (tb, 128) [cols >=50 are 0]

    # ---- fc2 (output padded to 128 lanes -> unmasked lane-dense store) ----
    # TODO(synk): training-mode F.dropout not implemented (eval identity).
    logits = jnp.dot(h, wf2_ref[...], preferred_element_type=jnp.float32) + bf2_ref[...]
    o_ref[...] = logits.astype(o_ref.dtype)


# ----------------------------------------------------------------------------
# Wrapper
# ----------------------------------------------------------------------------
def cnn_mnist_forward(x_nchw, packed, *, num_classes, block_batch=None):
    """Eval-mode CNNMnist forward. x_nchw: [B, Cin, 28, 28] float32."""
    B, Cin, H, W = x_nchw.shape
    assert H == H_IN and W == H_IN, "CNNMnist requires 28x28 inputs (fc1 is 320-wide)"
    NCP = packed["bf2"].shape[1]                         # padded logits width (>=128)
    if block_batch is not None:
        tb = block_batch
    else:
        tb = 64 if B >= 64 else (32 if B >= 32 else 8)
    Bp = ((B + tb - 1) // tb) * tb

    xp = x_nchw.astype(jnp.float32)
    if Bp != B:
        xp = jnp.pad(xp, ((0, Bp - B), (0, 0), (0, 0), (0, 0)))
    # Pack input into per-batch-tile 2-D slabs: xw[i, h*tb + b, w*Cin + c]
    xw = jnp.transpose(xp, (2, 0, 3, 1))                          # (H, Bp, W, Cin)
    xw = xw.reshape(H, Bp // tb, tb, W * Cin)
    xw = jnp.transpose(xw, (1, 0, 2, 3)).reshape(Bp // tb, H * tb, W * Cin)

    out = pl.pallas_call(
        functools.partial(_cnn_fused_kernel, tb=tb),
        out_shape=jax.ShapeDtypeStruct((Bp, NCP), jnp.float32),
        grid=(Bp // tb,),
        in_specs=[
            pl.BlockSpec((1, H * tb, W * Cin), lambda i: (i, 0, 0)),
            pl.BlockSpec(packed["w1"].shape, lambda i: (0, 0, 0)),
            pl.BlockSpec(packed["b1"].shape, lambda i: (0, 0)),
            pl.BlockSpec(packed["w2"].shape, lambda i: (0, 0, 0)),
            pl.BlockSpec(packed["b2"].shape, lambda i: (0, 0)),
            pl.BlockSpec(packed["wf1"].shape, lambda i: (0, 0, 0)),
            pl.BlockSpec(packed["bf1"].shape, lambda i: (0, 0)),
            pl.BlockSpec(packed["wf2"].shape, lambda i: (0, 0)),
            pl.BlockSpec(packed["bf2"].shape, lambda i: (0, 0)),
        ],
        out_specs=pl.BlockSpec((tb, NCP), lambda i: (i, 0)),
        compiler_params=pltpu.CompilerParams(dimension_semantics=("parallel",)),
    )(xw, packed["w1"], packed["b1"], packed["w2"], packed["b2"],
      packed["wf1"], packed["bf1"], packed["wf2"], packed["bf2"])
    return out[:B, :num_classes]


# ----------------------------------------------------------------------------
# Parameters: PyTorch-style raw params + packing into kernel layout
# ----------------------------------------------------------------------------
def init_raw_params(key, num_channels=1, num_classes=10):
    """Mimics PyTorch default U(-1/sqrt(fan_in), +1/sqrt(fan_in)) init."""
    ks = jax.random.split(key, 8)

    def u(k, shape, fan_in):
        bound = 1.0 / float(fan_in) ** 0.5
        return jax.random.uniform(k, shape, jnp.float32, -bound, bound)

    w1 = u(ks[0], (10, num_channels, KSZ, KSZ), num_channels * KSZ * KSZ)
    b1 = u(ks[1], (10,), num_channels * KSZ * KSZ)
    w2 = u(ks[2], (20, 10, KSZ, KSZ), 10 * KSZ * KSZ)
    b2 = u(ks[3], (20,), 10 * KSZ * KSZ)
    fc1_w = u(ks[4], (50, 320), 320)
    fc1_b = u(ks[5], (50,), 320)
    fc2_w = u(ks[6], (num_classes, 50), 50)
    fc2_b = u(ks[7], (num_classes,), 50)
    return dict(w1=w1, b1=b1, w2=w2, b2=b2,
                fc1_w=fc1_w, fc1_b=fc1_b, fc2_w=fc2_w, fc2_b=fc2_b)


def pack_params(raw):
    """Fold im2col / pooling column order / flatten order into banded weights.

    fc1 hidden and fc2 logits widths are zero-padded to a multiple of 128 so
    every matmul output and the final store are 128-lane aligned.
    """
    w1 = np.asarray(raw["w1"]); b1 = np.asarray(raw["b1"])
    w2 = np.asarray(raw["w2"]); b2 = np.asarray(raw["b2"])
    fc1_w = np.asarray(raw["fc1_w"]); fc1_b = np.asarray(raw["fc1_b"])
    fc2_w = np.asarray(raw["fc2_w"]); fc2_b = np.asarray(raw["fc2_b"])
    c1, cin = w1.shape[0], w1.shape[1]          # 10, Cin
    c2 = w2.shape[0]                            # 20
    nf1 = fc1_w.shape[0]                        # 50
    nc = fc2_w.shape[0]
    nf1p = _pad_to_lane(nf1)                    # 128
    ncp = _pad_to_lane(nc)                      # 128

    # conv1: rows = w_in*Cin + c ; cols = dw*128 + pw*10 + co  (ow = 2*pw + dw)
    W1 = np.zeros((KSZ, H_IN * cin, 2 * LANE), np.float32)
    b1f = np.zeros((1, 2 * LANE), np.float32)
    for ow in range(H1):
        pw, dw = ow // 2, ow % 2
        c0 = dw * LANE + pw * c1
        b1f[0, c0:c0 + c1] = b1
        for kh in range(KSZ):
            for kw in range(KSZ):
                w_in = ow + kw
                W1[kh, w_in * cin:(w_in + 1) * cin, c0:c0 + c1] = w1[:, :, kh, kw].T

    # conv2: rows = pool1 layout (w*10 + c) ; cols = dw*128 + pw*20 + co
    W2 = np.zeros((KSZ, LANE, 2 * LANE), np.float32)
    b2f = np.zeros((1, 2 * LANE), np.float32)
    for ow in range(H2):
        pw, dw = ow // 2, ow % 2
        c0 = dw * LANE + pw * c2
        b2f[0, c0:c0 + c2] = b2
        for kh in range(KSZ):
            for kw in range(KSZ):
                w_in = ow + kw
                W2[kh, w_in * c1:(w_in + 1) * c1, c0:c0 + c2] = w2[:, :, kh, kw].T

    # fc1: rows = pool2 layout (pw*20 + co); PyTorch flatten index = co*16 + ph*4 + pw
    Wf1 = np.zeros((P2, LANE, nf1p), np.float32)
    for ph in range(P2):
        for pw in range(P2):
            for co in range(c2):
                Wf1[ph, pw * c2 + co, :nf1] = fc1_w[:, co * (P2 * P2) + ph * P2 + pw]
    bf1 = np.zeros((1, nf1p), np.float32)
    bf1[0, :nf1] = fc1_b

    # fc2: padded (nf1p, ncp); extra rows/cols are zero so padded h columns are inert.
    Wf2 = np.zeros((nf1p, ncp), np.float32)
    Wf2[:nf1, :nc] = fc2_w.T
    bf2 = np.zeros((1, ncp), np.float32)
    bf2[0, :nc] = fc2_b

    return dict(
        w1=jnp.asarray(W1), b1=jnp.asarray(b1f),
        w2=jnp.asarray(W2), b2=jnp.asarray(b2f),
        wf1=jnp.asarray(Wf1), bf1=jnp.asarray(bf1),
        wf2=jnp.asarray(Wf2), bf2=jnp.asarray(bf2),
    )


# ----------------------------------------------------------------------------
# Pure-JAX reference (for numerical self-check)
# ----------------------------------------------------------------------------
def _pool_ref(y):
    B, C, H, W = y.shape
    return y.reshape(B, C, H // 2, 2, W // 2, 2).max(axis=(3, 5))


def reference_forward(x_nchw, raw):
    dn = ("NCHW", "OIHW", "NCHW")
    y = lax.conv_general_dilated(x_nchw, raw["w1"], (1, 1), "VALID", dimension_numbers=dn)
    y = jax.nn.relu(_pool_ref(y + raw["b1"][None, :, None, None]))
    y = lax.conv_general_dilated(y, raw["w2"], (1, 1), "VALID", dimension_numbers=dn)
    y = jax.nn.relu(_pool_ref(y + raw["b2"][None, :, None, None]))
    flat = y.reshape(y.shape[0], -1)
    h = jax.nn.relu(flat @ raw["fc1_w"].T + raw["fc1_b"])
    return h @ raw["fc2_w"].T + raw["fc2_b"]


# ----------------------------------------------------------------------------
if __name__ == "__main__":
    key = jax.random.PRNGKey(0)
    k_x, k_p = jax.random.split(key)

    B, CIN, NC = 2, 1, 10
    # 28x28 is required so the flattened feature size is 320 (= 20*4*4), as fc1 expects.
    x = jax.random.normal(k_x, (B, CIN, H_IN, H_IN), dtype=jnp.float32)
    raw = init_raw_params(k_p, num_channels=CIN, num_classes=NC)
    packed = pack_params(raw)

    fwd = jax.jit(functools.partial(cnn_mnist_forward, num_classes=NC))
    logits = fwd(x, packed)
    jax.block_until_ready(logits)
    assert logits.shape == (B, NC)

    ref = reference_forward(x, raw)
    err = float(jnp.max(jnp.abs(logits - ref)))
    assert err < 2e-3, f"mismatch vs reference: max abs err = {err}"
    print("KERNEL_OK")
</pallas_src>

<mosaic_0001>
module attributes {stable_mosaic.version = 11 : i64} {
  func.func @_cnn_fused_kernel(%arg0: i32, %arg1: memref<1x224x28xf32, #tpu.memory_space<vmem>>, %arg2: memref<5x28x256xf32, #tpu.memory_space<vmem>>, %arg3: memref<1x256xf32, #tpu.memory_space<vmem>>, %arg4: memref<5x128x256xf32, #tpu.memory_space<vmem>>, %arg5: memref<1x256xf32, #tpu.memory_space<vmem>>, %arg6: memref<4x128x128xf32, #tpu.memory_space<vmem>>, %arg7: memref<1x128xf32, #tpu.memory_space<vmem>>, %arg8: memref<128x128xf32, #tpu.memory_space<vmem>>, %arg9: memref<1x128xf32, #tpu.memory_space<vmem>>, %arg10: memref<8x128xf32, #tpu.memory_space<vmem>>) attributes {dimension_semantics = [#tpu.dimension_semantics<parallel>], iteration_bounds = array<i64: 1>, scalar_prefetch = 0 : i64, scratch_operands = 0 : i64, tpu.core_type = #tpu.core_type<tc>, window_params = [{transform_indices = @transform_0, window_bounds = array<i64: 1, 224, 28>}, {pipeline_mode = #tpu.pipeline_mode<synchronous>, transform_indices = @transform_1, window_bounds = array<i64: 5, 28, 256>}, {pipeline_mode = #tpu.pipeline_mode<synchronous>, transform_indices = @transform_2, window_bounds = array<i64: 1, 256>}, {pipeline_mode = #tpu.pipeline_mode<synchronous>, transform_indices = @transform_3, window_bounds = array<i64: 5, 128, 256>}, {pipeline_mode = #tpu.pipeline_mode<synchronous>, transform_indices = @transform_4, window_bounds = array<i64: 1, 256>}, {pipeline_mode = #tpu.pipeline_mode<synchronous>, transform_indices = @transform_5, window_bounds = array<i64: 4, 128, 128>}, {pipeline_mode = #tpu.pipeline_mode<synchronous>, transform_indices = @transform_6, window_bounds = array<i64: 1, 128>}, {pipeline_mode = #tpu.pipeline_mode<synchronous>, transform_indices = @transform_7, window_bounds = array<i64: 128, 128>}, {pipeline_mode = #tpu.pipeline_mode<synchronous>, transform_indices = @transform_8, window_bounds = array<i64: 1, 128>}, {transform_indices = @transform_9, window_bounds = array<i64: 8, 128>}]} {
    %c0 = arith.constant 0 : index
    %c0_0 = arith.constant 0 : index
    %c0_1 = arith.constant 0 : index
    %0 = vector.load %arg1[%c0, %c0_0, %c0_1] : memref<1x224x28xf32, #tpu.memory_space<vmem>>, vector<1x224x28xf32>
    %1 = vector.shape_cast %0 : vector<1x224x28xf32> to vector<224x28xf32>
    %2 = vector.extract_strided_slice %1 {offsets = [0, 0], sizes = [192, 28], strides = [1, 1]} : vector<224x28xf32> to vector<192x28xf32>
    %c0_2 = arith.constant 0 : index
    %c0_3 = arith.constant 0 : index
    %c0_4 = arith.constant 0 : index
    %3 = vector.load %arg2[%c0_2, %c0_3, %c0_4] : memref<5x28x256xf32, #tpu.memory_space<vmem>>, vector<1x28x256xf32>
    %4 = vector.shape_cast %3 : vector<1x28x256xf32> to vector<28x256xf32>
    %cst = arith.constant dense<0.000000e+00> : vector<192x256xf32>
    %5 = tpu.matmul %2, %4, %cst {dimension_numbers = #tpu.dot_dimension_numbers<[1], [0], [0], [1], [0, 0, 1, 1], [], []>} : vector<192x28xf32>, vector<28x256xf32>, vector<192x256xf32> -> vector<192x256xf32>
    %6 = vector.extract_strided_slice %1 {offsets = [8, 0], sizes = [192, 28], strides = [1, 1]} : vector<224x28xf32> to vector<192x28xf32>
    %c1 = arith.constant 1 : index
    %c0_5 = arith.constant 0 : index
    %c0_6 = arith.constant 0 : index
    %7 = vector.load %arg2[%c1, %c0_5, %c0_6] : memref<5x28x256xf32, #tpu.memory_space<vmem>>, vector<1x28x256xf32>
    %8 = vector.shape_cast %7 : vector<1x28x256xf32> to vector<28x256xf32>
    %cst_7 = arith.constant dense<0.000000e+00> : vector<192x256xf32>
    %9 = tpu.matmul %6, %8, %cst_7 {dimension_numbers = #tpu.dot_dimension_numbers<[1], [0], [0], [1], [0, 0, 1, 1], [], []>} : vector<192x28xf32>, vector<28x256xf32>, vector<192x256xf32> -> vector<192x256xf32>
    %10 = arith.addf %5, %9 : vector<192x256xf32>
    %11 = vector.extract_strided_slice %1 {offsets = [16, 0], sizes = [192, 28], strides = [1, 1]} : vector<224x28xf32> to vector<192x28xf32>
    %c2 = arith.constant 2 : index
    %c0_8 = arith.constant 0 : index
    %c0_9 = arith.constant 0 : index
    %12 = vector.load %arg2[%c2, %c0_8, %c0_9] : memref<5x28x256xf32, #tpu.memory_space<vmem>>, vector<1x28x256xf32>
    %13 = vector.shape_cast %12 : vector<1x28x256xf32> to vector<28x256xf32>
    %cst_10 = arith.constant dense<0.000000e+00> : vector<192x256xf32>
    %14 = tpu.matmul %11, %13, %cst_10 {dimension_numbers = #tpu.dot_dimension_numbers<[1], [0], [0], [1], [0, 0, 1, 1], [], []>} : vector<192x28xf32>, vector<28x256xf32>, vector<192x256xf32> -> vector<192x256xf32>
    %15 = arith.addf %10, %14 : vector<192x256xf32>
    %16 = vector.extract_strided_slice %1 {offsets = [24, 0], sizes = [192, 28], strides = [1, 1]} : vector<224x28xf32> to vector<192x28xf32>
    %c3 = arith.constant 3 : index
    %c0_11 = arith.constant 0 : index
    %c0_12 = arith.constant 0 : index
    %17 = vector.load %arg2[%c3, %c0_11, %c0_12] : memref<5x28x256xf32, #tpu.memory_space<vmem>>, vector<1x28x256xf32>
    %18 = vector.shape_cast %17 : vector<1x28x256xf32> to vector<28x256xf32>
    %cst_13 = arith.constant dense<0.000000e+00> : vector<192x256xf32>
    %19 = tpu.matmul %16, %18, %cst_13 {dimension_numbers = #tpu.dot_dimension_numbers<[1], [0], [0], [1], [0, 0, 1, 1], [], []>} : vector<192x28xf32>, vector<28x256xf32>, vector<192x256xf32> -> vector<192x256xf32>
    %20 = arith.addf %15, %19 : vector<192x256xf32>
    %21 = vector.extract_strided_slice %1 {offsets = [32, 0], sizes = [192, 28], strides = [1, 1]} : vector<224x28xf32> to vector<192x28xf32>
    %c4 = arith.constant 4 : index
    %c0_14 = arith.constant 0 : index
    %c0_15 = arith.constant 0 : index
    %22 = vector.load %arg2[%c4, %c0_14, %c0_15] : memref<5x28x256xf32, #tpu.memory_space<vmem>>, vector<1x28x256xf32>
    %23 = vector.shape_cast %22 : vector<1x28x256xf32> to vector<28x256xf32>
    %cst_16 = arith.constant dense<0.000000e+00> : vector<192x256xf32>
    %24 = tpu.matmul %21, %23, %cst_16 {dimension_numbers = #tpu.dot_dimension_numbers<[1], [0], [0], [1], [0, 0, 1, 1], [], []>} : vector<192x28xf32>, vector<28x256xf32>, vector<192x256xf32> -> vector<192x256xf32>
    %25 = arith.addf %20, %24 : vector<192x256xf32>
    %c0_17 = arith.constant 0 : index
    %c0_18 = arith.constant 0 : index
    %26 = vector.load %arg3[%c0_17, %c0_18] : memref<1x256xf32, #tpu.memory_space<vmem>>, vector<1x256xf32>
    %27 = vector.broadcast %26 : vector<1x256xf32> to vector<192x256xf32>
    %28 = arith.addf %25, %27 : vector<192x256xf32>
    %29 = vector.extract_strided_slice %28 {offsets = [0, 0], sizes = [192, 128], strides = [1, 1]} : vector<192x256xf32> to vector<192x128xf32>
    %30 = vector.extract_strided_slice %28 {offsets = [0, 128], sizes = [192, 128], strides = [1, 1]} : vector<192x256xf32> to vector<192x128xf32>
    %31 = arith.maximumf %29, %30 : vector<192x128xf32>
    %32 = vector.extract_strided_slice %31 {offsets = [0, 0], sizes = [8, 128], strides = [1, 1]} : vector<192x128xf32> to vector<8x128xf32>
    %33 = vector.extract_strided_slice %31 {offsets = [8, 0], sizes = [8, 128], strides = [1, 1]} : vector<192x128xf32> to vector<8x128xf32>
    %34 = arith.maximumf %32, %33 : vector<8x128xf32>
    %35 = vector.extract_strided_slice %31 {offsets = [16, 0], sizes = [8, 128], strides = [1, 1]} : vector<192x128xf32> to vector<8x128xf32>
    %36 = vector.extract_strided_slice %31 {offsets = [24, 0], sizes = [8, 128], strides = [1, 1]} : vector<192x128xf32> to vector<8x128xf32>
    %37 = arith.maximumf %35, %36 : vector<8x128xf32>
    %38 = vector.extract_strided_slice %31 {offsets = [32, 0], sizes = [8, 128], strides = [1, 1]} : vector<192x128xf32> to vector<8x128xf32>
    %39 = vector.extract_strided_slice %31 {offsets = [40, 0], sizes = [8, 128], strides = [1, 1]} : vector<192x128xf32> to vector<8x128xf32>
    %40 = arith.maximumf %38, %39 : vector<8x128xf32>
    %41 = vector.extract_strided_slice %31 {offsets = [48, 0], sizes = [8, 128], strides = [1, 1]} : vector<192x128xf32> to vector<8x128xf32>
    %42 = vector.extract_strided_slice %31 {offsets = [56, 0], sizes = [8, 128], strides = [1, 1]} : vector<192x128xf32> to vector<8x128xf32>
    %43 = arith.maximumf %41, %42 : vector<8x128xf32>
    %44 = vector.extract_strided_slice %31 {offsets = [64, 0], sizes = [8, 128], strides = [1, 1]} : vector<192x128xf32> to vector<8x128xf32>
    %45 = vector.extract_strided_slice %31 {offsets = [72, 0], sizes = [8, 128], strides = [1, 1]} : vector<192x128xf32> to vector<8x128xf32>
    %46 = arith.maximumf %44, %45 : vector<8x128xf32>
    %47 = vector.extract_strided_slice %31 {offsets = [80, 0], sizes = [8, 128], strides = [1, 1]} : vector<192x128xf32> to vector<8x128xf32>
    %48 = vector.extract_strided_slice %31 {offsets = [88, 0], sizes = [8, 128], strides = [1, 1]} : vector<192x128xf32> to vector<8x128xf32>
    %49 = arith.maximumf %47, %48 : vector<8x128xf32>
    %50 = vector.extract_strided_slice %31 {offsets = [96, 0], sizes = [8, 128], strides = [1, 1]} : vector<192x128xf32> to vector<8x128xf32>
    %51 = vector.extract_strided_slice %31 {offsets = [104, 0], sizes = [8, 128], strides = [1, 1]} : vector<192x128xf32> to vector<8x128xf32>
    %52 = arith.maximumf %50, %51 : vector<8x128xf32>
    %53 = vector.extract_strided_slice %31 {offsets = [112, 0], sizes = [8, 128], strides = [1, 1]} : vector<192x128xf32> to vector<8x128xf32>
    %54 = vector.extract_strided_slice %31 {offsets = [120, 0], sizes = [8, 128], strides = [1, 1]} : vector<192x128xf32> to vector<8x128xf32>
    %55 = arith.maximumf %53, %54 : vector<8x128xf32>
    %56 = vector.extract_strided_slice %31 {offsets = [128, 0], sizes = [8, 128], strides = [1, 1]} : vector<192x128xf32> to vector<8x128xf32>
    %57 = vector.extract_strided_slice %31 {offsets = [136, 0], sizes = [8, 128], strides = [1, 1]} : vector<192x128xf32> to vector<8x128xf32>
    %58 = arith.maximumf %56, %57 : vector<8x128xf32>
    %59 = vector.extract_strided_slice %31 {offsets = [144, 0], sizes = [8, 128], strides = [1, 1]} : vector<192x128xf32> to vector<8x128xf32>
    %60 = vector.extract_strided_slice %31 {offsets = [152, 0], sizes = [8, 128], strides = [1, 1]} : vector<192x128xf32> to vector<8x128xf32>
    %61 = arith.maximumf %59, %60 : vector<8x128xf32>
    %62 = vector.extract_strided_slice %31 {offsets = [160, 0], sizes = [8, 128], strides = [1, 1]} : vector<192x128xf32> to vector<8x128xf32>
    %63 = vector.extract_strided_slice %31 {offsets = [168, 0], sizes = [8, 128], strides = [1, 1]} : vector<192x128xf32> to vector<8x128xf32>
    %64 = arith.maximumf %62, %63 : vector<8x128xf32>
    %65 = vector.extract_strided_slice %31 {offsets = [176, 0], sizes = [8, 128], strides = [1, 1]} : vector<192x128xf32> to vector<8x128xf32>
    %66 = vector.extract_strided_slice %31 {offsets = [184, 0], sizes = [8, 128], strides = [1, 1]} : vector<192x128xf32> to vector<8x128xf32>
    %67 = arith.maximumf %65, %66 : vector<8x128xf32>
    %68 = tpu.concatenate %34, %37, %40, %43, %46, %49, %52, %55, %58, %61, %64, %67 in 0 : vector<8x128xf32>, vector<8x128xf32>, vector<8x128xf32>, vector<8x128xf32>, vector<8x128xf32>, vector<8x128xf32>, vector<8x128xf32>, vector<8x128xf32>, vector<8x128xf32>, vector<8x128xf32>, vector<8x128xf32>, vector<8x128xf32> -> vector<96x128xf32>
    %cst_19 = arith.constant 0.000000e+00 : f32
    %69 = vector.broadcast %cst_19 : f32 to vector<96x128xf32>
    %70 = arith.maximumf %68, %69 : vector<96x128xf32>
    %71 = vector.extract_strided_slice %70 {offsets = [0, 0], sizes = [64, 128], strides = [1, 1]} : vector<96x128xf32> to vector<64x128xf32>
    %c0_20 = arith.constant 0 : index
    %c0_21 = arith.constant 0 : index
    %c0_22 = arith.constant 0 : index
    %72 = vector.load %arg4[%c0_20, %c0_21, %c0_22] : memref<5x128x256xf32, #tpu.memory_space<vmem>>, vector<1x128x256xf32>
    %73 = vector.shape_cast %72 : vector<1x128x256xf32> to vector<128x256xf32>
    %cst_23 = arith.constant dense<0.000000e+00> : vector<64x256xf32>
    %74 = tpu.matmul %71, %73, %cst_23 {dimension_numbers = #tpu.dot_dimension_numbers<[1], [0], [0], [1], [0, 0, 1, 1], [], []>} : vector<64x128xf32>, vector<128x256xf32>, vector<64x256xf32> -> vector<64x256xf32>
    %75 = vector.extract_strided_slice %70 {offsets = [8, 0], sizes = [64, 128], strides = [1, 1]} : vector<96x128xf32> to vector<64x128xf32>
    %c1_24 = arith.constant 1 : index
    %c0_25 = arith.constant 0 : index
    %c0_26 = arith.constant 0 : index
    %76 = vector.load %arg4[%c1_24, %c0_25, %c0_26] : memref<5x128x256xf32, #tpu.memory_space<vmem>>, vector<1x128x256xf32>
    %77 = vector.shape_cast %76 : vector<1x128x256xf32> to vector<128x256xf32>
    %cst_27 = arith.constant dense<0.000000e+00> : vector<64x256xf32>
    %78 = tpu.matmul %75, %77, %cst_27 {dimension_numbers = #tpu.dot_dimension_numbers<[1], [0], [0], [1], [0, 0, 1, 1], [], []>} : vector<64x128xf32>, vector<128x256xf32>, vector<64x256xf32> -> vector<64x256xf32>
    %79 = arith.addf %74, %78 : vector<64x256xf32>
    %80 = vector.extract_strided_slice %70 {offsets = [16, 0], sizes = [64, 128], strides = [1, 1]} : vector<96x128xf32> to vector<64x128xf32>
    %c2_28 = arith.constant 2 : index
    %c0_29 = arith.constant 0 : index
    %c0_30 = arith.constant 0 : index
    %81 = vector.load %arg4[%c2_28, %c0_29, %c0_30] : memref<5x128x256xf32, #tpu.memory_space<vmem>>, vector<1x128x256xf32>
    %82 = vector.shape_cast %81 : vector<1x128x256xf32> to vector<128x256xf32>
    %cst_31 = arith.constant dense<0.000000e+00> : vector<64x256xf32>
    %83 = tpu.matmul %80, %82, %cst_31 {dimension_numbers = #tpu.dot_dimension_numbers<[1], [0], [0], [1], [0, 0, 1, 1], [], []>} : vector<64x128xf32>, vector<128x256xf32>, vector<64x256xf32> -> vector<64x256xf32>
    %84 = arith.addf %79, %83 : vector<64x256xf32>
    %85 = vector.extract_strided_slice %70 {offsets = [24, 0], sizes = [64, 128], strides = [1, 1]} : vector<96x128xf32> to vector<64x128xf32>
    %c3_32 = arith.constant 3 : index
    %c0_33 = arith.constant 0 : index
    %c0_34 = arith.constant 0 : index
    %86 = vector.load %arg4[%c3_32, %c0_33, %c0_34] : memref<5x128x256xf32, #tpu.memory_space<vmem>>, vector<1x128x256xf32>
    %87 = vector.shape_cast %86 : vector<1x128x256xf32> to vector<128x256xf32>
    %cst_35 = arith.constant dense<0.000000e+00> : vector<64x256xf32>
    %88 = tpu.matmul %85, %87, %cst_35 {dimension_numbers = #tpu.dot_dimension_numbers<[1], [0], [0], [1], [0, 0, 1, 1], [], []>} : vector<64x128xf32>, vector<128x256xf32>, vector<64x256xf32> -> vector<64x256xf32>
    %89 = arith.addf %84, %88 : vector<64x256xf32>
    %90 = vector.extract_strided_slice %70 {offsets = [32, 0], sizes = [64, 128], strides = [1, 1]} : vector<96x128xf32> to vector<64x128xf32>
    %c4_36 = arith.constant 4 : index
    %c0_37 = arith.constant 0 : index
    %c0_38 = arith.constant 0 : index
    %91 = vector.load %arg4[%c4_36, %c0_37, %c0_38] : memref<5x128x256xf32, #tpu.memory_space<vmem>>, vector<1x128x256xf32>
    %92 = vector.shape_cast %91 : vector<1x128x256xf32> to vector<128x256xf32>
    %cst_39 = arith.constant dense<0.000000e+00> : vector<64x256xf32>
    %93 = tpu.matmul %90, %92, %cst_39 {dimension_numbers = #tpu.dot_dimension_numbers<[1], [0], [0], [1], [0, 0, 1, 1], [], []>} : vector<64x128xf32>, vector<128x256xf32>, vector<64x256xf32> -> vector<64x256xf32>
    %94 = arith.addf %89, %93 : vector<64x256xf32>
    %c0_40 = arith.constant 0 : index
    %c0_41 = arith.constant 0 : index
    %95 = vector.load %arg5[%c0_40, %c0_41] : memref<1x256xf32, #tpu.memory_space<vmem>>, vector<1x256xf32>
    %96 = vector.broadcast %95 : vector<1x256xf32> to vector<64x256xf32>
    %97 = arith.addf %94, %96 : vector<64x256xf32>
    %98 = vector.extract_strided_slice %97 {offsets = [0, 0], sizes = [64, 128], strides = [1, 1]} : vector<64x256xf32> to vector<64x128xf32>
    %99 = vector.extract_strided_slice %97 {offsets = [0, 128], sizes = [64, 128], strides = [1, 1]} : vector<64x256xf32> to vector<64x128xf32>
    %100 = arith.maximumf %98, %99 : vector<64x128xf32>
    %101 = vector.extract_strided_slice %100 {offsets = [0, 0], sizes = [8, 128], strides = [1, 1]} : vector<64x128xf32> to vector<8x128xf32>
    %102 = vector.extract_strided_slice %100 {offsets = [8, 0], sizes = [8, 128], strides = [1, 1]} : vector<64x128xf32> to vector<8x128xf32>
    %103 = arith.maximumf %101, %102 : vector<8x128xf32>
    %104 = vector.extract_strided_slice %100 {offsets = [16, 0], sizes = [8, 128], strides = [1, 1]} : vector<64x128xf32> to vector<8x128xf32>
    %105 = vector.extract_strided_slice %100 {offsets = [24, 0], sizes = [8, 128], strides = [1, 1]} : vector<64x128xf32> to vector<8x128xf32>
    %106 = arith.maximumf %104, %105 : vector<8x128xf32>
    %107 = vector.extract_strided_slice %100 {offsets = [32, 0], sizes = [8, 128], strides = [1, 1]} : vector<64x128xf32> to vector<8x128xf32>
    %108 = vector.extract_strided_slice %100 {offsets = [40, 0], sizes = [8, 128], strides = [1, 1]} : vector<64x128xf32> to vector<8x128xf32>
    %109 = arith.maximumf %107, %108 : vector<8x128xf32>
    %110 = vector.extract_strided_slice %100 {offsets = [48, 0], sizes = [8, 128], strides = [1, 1]} : vector<64x128xf32> to vector<8x128xf32>
    %111 = vector.extract_strided_slice %100 {offsets = [56, 0], sizes = [8, 128], strides = [1, 1]} : vector<64x128xf32> to vector<8x128xf32>
    %112 = arith.maximumf %110, %111 : vector<8x128xf32>
    %113 = tpu.concatenate %103, %106, %109, %112 in 0 : vector<8x128xf32>, vector<8x128xf32>, vector<8x128xf32>, vector<8x128xf32> -> vector<32x128xf32>
    %cst_42 = arith.constant 0.000000e+00 : f32
    %114 = vector.broadcast %cst_42 : f32 to vector<32x128xf32>
    %115 = arith.maximumf %113, %114 : vector<32x128xf32>
    %116 = vector.extract_strided_slice %115 {offsets = [0, 0], sizes = [8, 128], strides = [1, 1]} : vector<32x128xf32> to vector<8x128xf32>
    %c0_43 = arith.constant 0 : index
    %c0_44 = arith.constant 0 : index
    %c0_45 = arith.constant 0 : index
    %117 = vector.load %arg6[%c0_43, %c0_44, %c0_45] : memref<4x128x128xf32, #tpu.memory_space<vmem>>, vector<1x128x128xf32>
    %118 = vector.shape_cast %117 : vector<1x128x128xf32> to vector<128x128xf32>
    %cst_46 = arith.constant dense<0.000000e+00> : vector<8x128xf32>
    %119 = tpu.matmul %116, %118, %cst_46 {dimension_numbers = #tpu.dot_dimension_numbers<[1], [0], [0], [1], [0, 0, 1, 1], [], []>} : vector<8x128xf32>, vector<128x128xf32>, vector<8x128xf32> -> vector<8x128xf32>
    %120 = vector.extract_strided_slice %115 {offsets = [8, 0], sizes = [8, 128], strides = [1, 1]} : vector<32x128xf32> to vector<8x128xf32>
    %c1_47 = arith.constant 1 : index
    %c0_48 = arith.constant 0 : index
    %c0_49 = arith.constant 0 : index
    %121 = vector.load %arg6[%c1_47, %c0_48, %c0_49] : memref<4x128x128xf32, #tpu.memory_space<vmem>>, vector<1x128x128xf32>
    %122 = vector.shape_cast %121 : vector<1x128x128xf32> to vector<128x128xf32>
    %cst_50 = arith.constant dense<0.000000e+00> : vector<8x128xf32>
    %123 = tpu.matmul %120, %122, %cst_50 {dimension_numbers = #tpu.dot_dimension_numbers<[1], [0], [0], [1], [0, 0, 1, 1], [], []>} : vector<8x128xf32>, vector<128x128xf32>, vector<8x128xf32> -> vector<8x128xf32>
    %124 = arith.addf %119, %123 : vector<8x128xf32>
    %125 = vector.extract_strided_slice %115 {offsets = [16, 0], sizes = [8, 128], strides = [1, 1]} : vector<32x128xf32> to vector<8x128xf32>
    %c2_51 = arith.constant 2 : index
    %c0_52 = arith.constant 0 : index
    %c0_53 = arith.constant 0 : index
    %126 = vector.load %arg6[%c2_51, %c0_52, %c0_53] : memref<4x128x128xf32, #tpu.memory_space<vmem>>, vector<1x128x128xf32>
    %127 = vector.shape_cast %126 : vector<1x128x128xf32> to vector<128x128xf32>
    %cst_54 = arith.constant dense<0.000000e+00> : vector<8x128xf32>
    %128 = tpu.matmul %125, %127, %cst_54 {dimension_numbers = #tpu.dot_dimension_numbers<[1], [0], [0], [1], [0, 0, 1, 1], [], []>} : vector<8x128xf32>, vector<128x128xf32>, vector<8x128xf32> -> vector<8x128xf32>
    %129 = arith.addf %124, %128 : vector<8x128xf32>
    %130 = vector.extract_strided_slice %115 {offsets = [24, 0], sizes = [8, 128], strides = [1, 1]} : vector<32x128xf32> to vector<8x128xf32>
    %c3_55 = arith.constant 3 : index
    %c0_56 = arith.constant 0 : index
    %c0_57 = arith.constant 0 : index
    %131 = vector.load %arg6[%c3_55, %c0_56, %c0_57] : memref<4x128x128xf32, #tpu.memory_space<vmem>>, vector<1x128x128xf32>
    %132 = vector.shape_cast %131 : vector<1x128x128xf32> to vector<128x128xf32>
    %cst_58 = arith.constant dense<0.000000e+00> : vector<8x128xf32>
    %133 = tpu.matmul %130, %132, %cst_58 {dimension_numbers = #tpu.dot_dimension_numbers<[1], [0], [0], [1], [0, 0, 1, 1], [], []>} : vector<8x128xf32>, vector<128x128xf32>, vector<8x128xf32> -> vector<8x128xf32>
    %134 = arith.addf %129, %133 : vector<8x128xf32>
    %c0_59 = arith.constant 0 : index
    %c0_60 = arith.constant 0 : index
    %135 = vector.load %arg7[%c0_59, %c0_60] : memref<1x128xf32, #tpu.memory_space<vmem>>, vector<1x128xf32>
    %136 = vector.broadcast %135 : vector<1x128xf32> to vector<8x128xf32>
    %137 = arith.addf %134, %136 : vector<8x128xf32>
    %cst_61 = arith.constant 0.000000e+00 : f32
    %138 = vector.broadcast %cst_61 : f32 to vector<8x128xf32>
    %139 = arith.maximumf %137, %138 : vector<8x128xf32>
    %c0_62 = arith.constant 0 : index
    %c0_63 = arith.constant 0 : index
    %140 = vector.load %arg8[%c0_62, %c0_63] : memref<128x128xf32, #tpu.memory_space<vmem>>, vector<128x128xf32>
    %cst_64 = arith.constant dense<0.000000e+00> : vector<8x128xf32>
    %141 = tpu.matmul %139, %140, %cst_64 {dimension_numbers = #tpu.dot_dimension_numbers<[1], [0], [0], [1], [0, 0, 1, 1], [], []>} : vector<8x128xf32>, vector<128x128xf32>, vector<8x128xf32> -> vector<8x128xf32>
    %c0_65 = arith.constant 0 : index
    %c0_66 = arith.constant 0 : index
    %142 = vector.load %arg9[%c0_65, %c0_66] : memref<1x128xf32, #tpu.memory_space<vmem>>, vector<1x128xf32>
    %143 = vector.broadcast %142 : vector<1x128xf32> to vector<8x128xf32>
    %144 = arith.addf %141, %143 : vector<8x128xf32>
    %c0_67 = arith.constant 0 : index
    %c0_68 = arith.constant 0 : index
    %145 = vector.load %arg10[%c0_67, %c0_68] : memref<8x128xf32, #tpu.memory_space<vmem>>, vector<8x128xf32>
    tpu.vector_store %arg10[%c0_67, %c0_68], %144 {strides = array<i32>} : memref<8x128xf32, #tpu.memory_space<vmem>>, vector<8x128xf32>,
    return
  }
  func.func @transform_0(%arg0: i32) -> (i32, i32, i32) {
    %c0_i32 = arith.constant 0 : i32
    %c0_i32_0 = arith.constant 0 : i32
    %c0_i32_1 = arith.constant 0 : i32
    return %arg0, %c0_i32, %c0_i32_0 : i32, i32, i32
  }
  func.func @transform_1(%arg0: i32) -> (i32, i32, i32) {
    %c0_i32 = arith.constant 0 : i32
    %c0_i32_0 = arith.constant 0 : i32
    %c0_i32_1 = arith.constant 0 : i32
    %c0_i32_2 = arith.constant 0 : i32
    return %c0_i32, %c0_i32_0, %c0_i32_1 : i32, i32, i32
  }
  func.func @transform_2(%arg0: i32) -> (i32, i32) {
    %c0_i32 = arith.constant 0 : i32
    %c0_i32_0 = arith.constant 0 : i32
    %c0_i32_1 = arith.constant 0 : i32
    return %c0_i32, %c0_i32_0 : i32, i32
  }
  func.func @transform_3(%arg0: i32) -> (i32, i32, i32) {
    %c0_i32 = arith.constant 0 : i32
    %c0_i32_0 = arith.constant 0 : i32
    %c0_i32_1 = arith.constant 0 : i32
    %c0_i32_2 = arith.constant 0 : i32
    return %c0_i32, %c0_i32_0, %c0_i32_1 : i32, i32, i32
  }
  func.func @transform_4(%arg0: i32) -> (i32, i32) {
    %c0_i32 = arith.constant 0 : i32
    %c0_i32_0 = arith.constant 0 : i32
    %c0_i32_1 = arith.constant 0 : i32
    return %c0_i32, %c0_i32_0 : i32, i32
  }
  func.func @transform_5(%arg0: i32) -> (i32, i32, i32) {
    %c0_i32 = arith.constant 0 : i32
    %c0_i32_0 = arith.constant 0 : i32
    %c0_i32_1 = arith.constant 0 : i32
    %c0_i32_2 = arith.constant 0 : i32
    return %c0_i32, %c0_i32_0, %c0_i32_1 : i32, i32, i32
  }
  func.func @transform_6(%arg0: i32) -> (i32, i32) {
    %c0_i32 = arith.constant 0 : i32
    %c0_i32_0 = arith.constant 0 : i32
    %c0_i32_1 = arith.constant 0 : i32
    return %c0_i32, %c0_i32_0 : i32, i32
  }
  func.func @transform_7(%arg0: i32) -> (i32, i32) {
    %c0_i32 = arith.constant 0 : i32
    %c0_i32_0 = arith.constant 0 : i32
    %c0_i32_1 = arith.constant 0 : i32
    return %c0_i32, %c0_i32_0 : i32, i32
  }
  func.func @transform_8(%arg0: i32) -> (i32, i32) {
    %c0_i32 = arith.constant 0 : i32
    %c0_i32_0 = arith.constant 0 : i32
    %c0_i32_1 = arith.constant 0 : i32
    return %c0_i32, %c0_i32_0 : i32, i32
  }
  func.func @transform_9(%arg0: i32) -> (i32, i32) {
    %c0_i32 = arith.constant 0 : i32
    %c0_i32_0 = arith.constant 0 : i32
    return %arg0, %c0_i32 : i32, i32
  }
}

</mosaic_0001>

<bundles_post_ra>
// kernel: cnn_mnist_forward.1
= control target key start
LH: loop header
LB: loop body
LE: loop exit
PB: predicated region body
PF: predicated region fallthrough
CT: control target
= control target key end

     0   :  { %14 = vsyncpa [#allocation3], 0  ;;  %s5133_s0 = inlined_call_operand.vmem [shape: f32[1,224,28], index: 0, kind: input, shape index: {}]   ;;  %s5134_s1 = inlined_call_operand.hbm [shape: f32[5,28,256], index: 1, kind: input, shape index: {}]   ;;  %s5135_s2 = inlined_call_operand.vmem [shape: f32[1,256], index: 2, kind: input, shape index: {}]   ;;  %s5136_s3 = inlined_call_operand.hbm [shape: f32[5,128,256], index: 3, kind: input, shape index: {}]   ;;  %s5137_s4 = inlined_call_operand.vmem [shape: f32[1,256], index: 4, kind: input, shape index: {}]   ;;  %s5138_s5 = inlined_call_operand.vmem [shape: f32[4,128,128], index: 5, kind: input, shape index: {}]   ;;  %s5139_s6 = inlined_call_operand.vmem [shape: f32[1,128], index: 6, kind: input, shape index: {}]   ;;  %s5140_s7 = inlined_call_operand.vmem [shape: f32[128,128], index: 7, kind: input, shape index: {}]   ;;  %s5141_s8 = inlined_call_operand.vmem [shape: f32[1,128], index: 8, kind: input, shape index: {}]   ;;  %s5142_s9 = inlined_call_operand.vmem [shape: f32[8,128], index: 9, kind: output, shape index: {}]  }
   0x1   :  { %15 = vsyncpa [#allocation5], 0  ;;  %s3906_s30 = smov [#allocation2]   ;;  %s3858_s13 = scalar_lea.hbm %s5134_s1, 5120 }
   0x2   :  { %s23_s10 = sshll.u32 %s3906_s30, 4  ;;  %p3859_p0 = scmp.ne.s32.totalorder %s5134_s1, %s3858_s13  ;;  %s24_s10 = int_to_ptr.vmem [resolvable:$true] %s23_s10 }
   0x3   :  { %p3862_p1 = scmp.lt.u32.totalorder %s3858_s13, %s5134_s1 }
   0x5   :  { %p3864_p2 = pnand %p3862_p1, %p3859_p0 }
   0x7   :  { %3867 = shalt.err (!%p3864_p2)
}
   0x8   :  { %s3868_s18 = scalar_lea.vmem %s24_s10, 5120  ;;  %p3873_p4 = scmp.lt.s32.totalorder %s24_s10, %s24_s10 }
   0x9   :  { %p3869_p3 = scmp.ne.s32.totalorder %s24_s10, %s3868_s18  ;;  %p3874_p5 = scmp.lt.s32.totalorder %s3868_s18, %s3868_s18 }
   0xb   :  { %p3875_p6 = por %p3874_p5, %p3873_p4 }
   0xd   :  { %p3876_p7 = pnand %p3875_p6, %p3869_p3 }
   0xf   :  { %3879 = shalt.err (!%p3876_p7)
}
  0x10   :  { %s3907_s19 = smov 256   ;;  %s3908_s20 = smov 16  }
  0x11   :  { %29 = dma.hbm_to_vmem [thread:$0]  %s5134_s1, 5120, %s24_s10, [#allocation3], %s3907_s19, %s3907_s19, %s3908_s20  }
  0x12   :  { %s3909_s23 = smov [#allocation4]   ;;  %s3880_s27 = scalar_lea.hbm %s5136_s3, 20480 }
  0x13   :  { %s37_s24 = sshll.u32 %s3909_s23, 4  ;;  %p3881_p8 = scmp.ne.s32.totalorder %s5136_s3, %s3880_s27  ;;  %s38_s24 = int_to_ptr.vmem [resolvable:$true] %s37_s24 }
  0x14   :  { %p3884_p9 = scmp.lt.u32.totalorder %s3880_s27, %s5136_s3 }
  0x16   :  { %p3886_p10 = pnand %p3884_p9, %p3881_p8 }
  0x18   :  { %3889 = shalt.err (!%p3886_p10)
}
  0x19   :  { %s3890_s12 = scalar_lea.vmem %s38_s24, 20480  ;;  %p3895_p12 = scmp.lt.s32.totalorder %s38_s24, %s38_s24 }
  0x1a   :  { %p3891_p11 = scmp.ne.s32.totalorder %s38_s24, %s3890_s12  ;;  %p3896_p13 = scmp.lt.s32.totalorder %s3890_s12, %s3890_s12 }
  0x1c   :  { %p3897_p0 = por %p3896_p13, %p3895_p12 }
  0x1e   :  { %p3898_p1 = pnand %p3897_p0, %p3891_p11 }
  0x20   :  { %3901 = shalt.err (!%p3898_p1)
}
  0x21   :  { %43 = dma.hbm_to_vmem [thread:$0]  %s5136_s3, 20480, %s38_s24, [#allocation5], %s3907_s19, %s3907_s19, %s3908_s20  }
  0x22   :  { %3902 = dma.done.wait [#allocation3], 5120  }
  0x23   :  { %3903 = vsyncadd [#allocation3], 4294962176 }
  0x24   :  { %3904 = dma.done.wait [#allocation5], 20480  }
  0x25   :  { %3905 = vsyncadd [#allocation5], 4294946816  ;;  %v5144_v0 = vmov 0.0   ;;  %vm178_vm0 = vcmask 1043456   ;;  %v89_v1 = vld [vmem:[#allocation2 + $0x8] sm:$0xff]  ;;  %v91_v2 = vld [vmem:[#allocation2 + $0x18] sm:$0xff] }
  0x26   :  { %467 = vmatprep.mubr.f32.mxu0 %v5144_v0  ;;  %249 = vmatprep.mubr.f32.mxu1 %v5144_v0  ;;  %v88_v3 = vld [vmem:[#allocation2] sm:$0xff]  ;;  %v3274_v4 = vpack.c.bf16 %v91_v2, %v89_v1  ;;  %v90_v5 = vld [vmem:[#allocation2 + $0x10] sm:$0xff]  ;;  %v93_v6 = vld [vmem:[#allocation2 + $0x28] sm:$0xff]  ;;  %vm3911_vm1 = vmmov 1   ;;  %vm105_vm3 = vcmask 228352   ;;  %vm3913_vm4 = vmmov 0  }
  0x27   :  { %v95_v7 = vld [vmem:[#allocation2 + $0x38] sm:$0xf]  ;;  %v3276_v8 = vpack.c.bf16 %v90_v5, %v88_v3  ;;  %vm3990_vm2 = vmpackc.low %vm178_vm0, %vm3911_vm1  ;;  %v92_v11 = vld [vmem:[#allocation2 + $0x20] sm:$0xff] }
  0x28   :  { %v3278_v10 = vpack.c.bf16 %v95_v7, %v93_v6  ;;  %v94_v12 = vld [vmem:[#allocation2 + $0x30] sm:$0xf]  ;;  %3275 = vmatprep.subr.bf16.mxu0 %v3274_v4  ;;  %v614_v13 = vld [vmem:[#allocation2 + $0x88] sm:$0xff]  ;;  %v616_v14 = vld [vmem:[#allocation2 + $0x98] sm:$0xff] }
  0x29   :  { %3277 = vmatpush1.bf16.msra.mxu0 %v3276_v8  ;;  %v3281_v15 = vpack.c.bf16 %v94_v12, %v92_v11  ;;  %v3284_v16 = vpack.c.bf16 %v616_v14, %v614_v13  ;;  %v613_v17 = vld [vmem:[#allocation2 + $0x80] sm:$0xff]  ;;  %v615_v18 = vld [vmem:[#allocation2 + $0x90] sm:$0xff]  ;;  %v618_v21 = vld [vmem:[#allocation2 + $0xa8] sm:$0xff] }
  0x2a   :  { %3280 = vmatprep.subr.msk.bf16.mxu0 %vm3990_vm2, %v3278_v10  ;;  %v60_v19 = vld [vmem:[%s5133_s0] sm:$0xff]  ;;  %v3286_v20 = vpack.c.bf16 %v615_v18, %v613_v17  ;;  %v620_v22 = vld [vmem:[#allocation2 + $0xb8] sm:$0xf]  ;;  %v619_v25 = vld [vmem:[#allocation2 + $0xb0] sm:$0xf] }
  0x2b   :  { %v3288_v23 = vpack.c.bf16 %v620_v22, %v618_v21  ;;  %v617_v24 = vld [vmem:[#allocation2 + $0xa0] sm:$0xff]  ;;  %v4006_v26 = vld [vmem:[%s5133_s0 + $0x8] sm:$0xff]  ;;  %v891_v29 = vld [vmem:[#allocation2 + $0xd8] sm:$0xff] }
  0x2c   :  { %v3291_v27 = vpack.c.bf16 %v619_v25, %v617_v24  ;;  %v889_v28 = vld [vmem:[#allocation2 + $0xc8] sm:$0xff]  ;;  %v4016_v31 = vld [vmem:[%s5133_s0 + $0x10] sm:$0xff]  ;;  %v4026_v32 = vld [vmem:[%s5133_s0 + $0x18] sm:$0xff] }
  0x2d   :  { %3283 = vmatpush1.bf16.msk.msra.mxu0 %vm3990_vm2, %v3281_v15  ;;  %v3294_v30 = vpack.c.bf16 %v891_v29, %v889_v28  ;;  %v4034_v33 = vld [vmem:[%s5133_s0 + $0x20] sm:$0xff]  ;;  %v4042_v34 = vld [vmem:[%s5133_s0 + $0x28] sm:$0xff]  ;;  %v4050_v35 = vld [vmem:[%s5133_s0 + $0x30] sm:$0xff] }
  0x2e   :  { %3285 = vmatprep.subr.bf16.mxu0 %v3284_v16  ;;  %v4058_v36 = vld [vmem:[%s5133_s0 + $0x38] sm:$0xff]  ;;  %v4066_v37 = vld [vmem:[%s5133_s0 + $0x40] sm:$0xff]  ;;  %v4074_v38 = vld [vmem:[%s5133_s0 + $0x48] sm:$0xff] }
  0x2f   :  { %v4082_v39 = vld [vmem:[%s5133_s0 + $0x50] sm:$0xff]  ;;  %v4090_v40 = vld [vmem:[%s5133_s0 + $0x58] sm:$0xff]  ;;  %v4098_v41 = vld [vmem:[%s5133_s0 + $0x60] sm:$0xff] }
  0x30   :  { %2852 = vmatmul.mubr.msk.f32.vlgmr.msra.gmra.mrb[0].mxu0 %vm105_vm3, %v60_v19  ;;  %v4106_v42 = vld [vmem:[%s5133_s0 + $0x68] sm:$0xff]  ;;  %v4114_v43 = vld [vmem:[%s5133_s0 + $0x70] sm:$0xff]  ;;  %v4122_v44 = vld [vmem:[%s5133_s0 + $0x78] sm:$0xff] }
  0x31   :  { %3287 = vmatpush1.bf16.msra.mxu0 %v3286_v20  ;;  %473 = vmatprep.mubr.f32.mxu0 %v5144_v0  ;;  %v4130_v45 = vld [vmem:[%s5133_s0 + $0x80] sm:$0xff]  ;;  %v4138_v46 = vld [vmem:[%s5133_s0 + $0x88] sm:$0xff]  ;;  %v4146_v47 = vld [vmem:[%s5133_s0 + $0x90] sm:$0xff] }
  0x32   :  { %3290 = vmatprep.subr.msk.bf16.mxu0 %vm3990_vm2, %v3288_v23  ;;  %v4154_v48 = vld [vmem:[%s5133_s0 + $0x98] sm:$0xff]  ;;  %v4162_v49 = vld [vmem:[%s5133_s0 + $0xa0] sm:$0xff]  ;;  %v4170_v50 = vld [vmem:[%s5133_s0 + $0xa8] sm:$0xff] }
  0x33   :  { %v4178_v51 = vld [vmem:[%s5133_s0 + $0xb0] sm:$0xff]  ;;  %v4186_v52 = vld [vmem:[%s5133_s0 + $0xb8] sm:$0xff]  ;;  %v888_v53 = vld [vmem:[#allocation2 + $0xc0] sm:$0xff] }
  0x34   :  { %2853 = vmatmul.mubr.msk.f32.gmra.mrb[2].mxu0 %vm105_vm3, %v4006_v26  ;;  %v890_v54 = vld [vmem:[#allocation2 + $0xd0] sm:$0xff]  ;;  %v893_v55 = vld [vmem:[#allocation2 + $0xe8] sm:$0xff]  ;;  %v895_v56 = vld [vmem:[#allocation2 + $0xf8] sm:$0xf] }
  0x35   :  { %479 = vmatprep.mubr.f32.mxu0 %v5144_v0  ;;  %3293 = vmatpush1.bf16.msk.msra.mxu0 %vm3990_vm2, %v3291_v27  ;;  %v3296_v57 = vpack.c.bf16 %v890_v54, %v888_v53  ;;  %v3298_v58 = vpack.c.bf16 %v895_v56, %v893_v55  ;;  %v892_v59 = vld [vmem:[#allocation2 + $0xe0] sm:$0xff]  ;;  %v894_v60 = vld [vmem:[#allocation2 + $0xf0] sm:$0xf]  ;;  %v1164_v61 = vld [vmem:[#allocation2 + $0x108] sm:$0xff] }
  0x36   :  { %3295 = vmatprep.subr.bf16.mxu0 %v3294_v30  ;;  %v1166_v62 = vld [vmem:[#allocation2 + $0x118] sm:$0xff]  ;;  %v3301_v63 = vpack.c.bf16 %v894_v60, %v892_v59  ;;  %v98_v2 = vld [vmem:[#allocation2 + $0x48] sm:$0xff]  ;;  %v97_v5 = vld [vmem:[#allocation2 + $0x40] sm:$0xff] }
  0x37   :  { %v3304_v1 = vpack.c.bf16 %v1166_v62, %v1164_v61  ;;  %v100_v3 = vld [vmem:[#allocation2 + $0x58] sm:$0xff]  ;;  %v99_v6 = vld [vmem:[#allocation2 + $0x50] sm:$0xff]  ;;  %v102_v8 = vld [vmem:[#allocation2 + $0x68] sm:$0xff] }
  0x38   :  { %2854 = vmatmul.mubr.msk.f32.gmra.mrb[4].mxu0 %vm105_vm3, %v4016_v31  ;;  %v3264_v4 = vpack.c.bf16 %v100_v3, %v98_v2  ;;  %v3266_v7 = vpack.c.bf16 %v99_v6, %v97_v5  ;;  %v104_v10 = vld [vmem:[#allocation2 + $0x78] sm:$0xf]  ;;  %v101_v12 = vld [vmem:[#allocation2 + $0x60] sm:$0xff]  ;;  %v103_v13 = vld [vmem:[#allocation2 + $0x70] sm:$0xf] }
  0x39   :  { %485 = vmatprep.mubr.f32.mxu0 %v5144_v0  ;;  %v3268_v11 = vpack.c.bf16 %v104_v10, %v102_v8  ;;  %v3271_v14 = vpack.c.bf16 %v103_v13, %v101_v12  ;;  %v4286_v15 = vld [vmem:[%s5133_s0 + $0xc0] sm:$0xff]  ;;  %v4297_v16 = vld [vmem:[%s5133_s0 + $0xc8] sm:$0xff]  ;;  %v1165_v18 = vld [vmem:[#allocation2 + $0x110] sm:$0xff] }
  0x3a   :  { %3265 = vmatprep.subr.bf16.mxu1 %v3264_v4  ;;  %v1163_v17 = vld [vmem:[#allocation2 + $0x100] sm:$0xff]  ;;  %v1168_v19 = vld [vmem:[#allocation2 + $0x128] sm:$0xff]  ;;  %v1170_v20 = vld [vmem:[#allocation2 + $0x138] sm:$0xf] }
  0x3b   :  { %3267 = vmatpush1.bf16.msra.mxu1 %v3266_v7  ;;  %v3306_v21 = vpack.c.bf16 %v1165_v18, %v1163_v17  ;;  %v3308_v22 = vpack.c.bf16 %v1170_v20, %v1168_v19  ;;  %v1167_v23 = vld [vmem:[#allocation2 + $0x120] sm:$0xff]  ;;  %v1169_v24 = vld [vmem:[#allocation2 + $0x130] sm:$0xf]  ;;  %v1579_v9 = vld [vmem:[#allocation4 + $0x108] sm:$0xff] }
  0x3c   :  { %2855 = vmatmul.mubr.msk.f32.gmra.mrb[6].mxu0 %vm105_vm3, %v4026_v32  ;;  %3270 = vmatprep.subr.msk.bf16.mxu1 %vm3990_vm2, %v3268_v11  ;;  %v3311_v25 = vpack.c.bf16 %v1169_v24, %v1167_v23  ;;  %v1578_v27 = vld [vmem:[#allocation4 + $0x100] sm:$0xff]  ;;  %v1580_v29 = vld [vmem:[#allocation4 + $0x110] sm:$0xff]  ;;  %v1583_v30 = vld [vmem:[#allocation4 + $0x128] sm:$0xff] }
  0x3d   :  { %491 = vmatprep.mubr.f32.mxu0 %v5144_v0  ;;  %v1582_v54 = vld [vmem:[#allocation4 + $0x120] sm:$0xff]  ;;  %v1584_v55 = vld [vmem:[#allocation4 + $0x130] sm:$0xff]  ;;  %v1587_v56 = vld [vmem:[#allocation4 + $0x148] sm:$0xff] }
  0x3e   :  { %v1586_v60 = vld [vmem:[#allocation4 + $0x140] sm:$0xff]  ;;  %v1588_v61 = vld [vmem:[#allocation4 + $0x150] sm:$0xff]  ;;  %v1591_v62 = vld [vmem:[#allocation4 + $0x168] sm:$0xff] }
  0x3f   :  { %3273 = vmatpush1.bf16.msk.msra.mxu1 %vm3990_vm2, %v3271_v14  ;;  %v1590_v3 = vld [vmem:[#allocation4 + $0x160] sm:$0xff]  ;;  %v1592_v4 = vld [vmem:[#allocation4 + $0x170] sm:$0xff]  ;;  %v1603_v8 = vld [vmem:[#allocation4 + $0x1c8] sm:$0xff] }
  0x40   :  { %2856 = vmatmul.mubr.msk.f32.gmra.mrb[8].mxu0 %vm105_vm3, %v4034_v33  ;;  %v3328_v5 = vpack.c.bf16 %v1592_v4, %v1590_v3  ;;  %v86_v6 = vld [vmem:[%s5133_s0 + $0xd0] sm:$0xff]  ;;  %v1605_v10 = vld [vmem:[#allocation4 + $0x1d8] sm:$0xff]  ;;  %v1602_v12 = vld [vmem:[#allocation4 + $0x1c0] sm:$0xff] }
  0x41   :  { %497 = vmatprep.mubr.f32.mxu0 %v5144_v0  ;;  %v3338_v11 = vpack.c.bf16 %v1605_v10, %v1603_v8  ;;  %v1604_v13 = vld [vmem:[#allocation4 + $0x1d0] sm:$0xff]  ;;  %v1607_v17 = vld [vmem:[#allocation4 + $0x1e8] sm:$0xff]  ;;  %v1609_v18 = vld [vmem:[#allocation4 + $0x1f8] sm:$0xff]  ;;  %v1439_v8 = vlaneseq }
  0x42   :  { %2826 = vmatmul.mubr.msk.f32.vlgmr.msra.gmra.mrb[0].mxu1 %vm105_vm3, %v4006_v26  ;;  %v1581_v26 = vld [vmem:[#allocation4 + $0x118] sm:$0xff]  ;;  %v3342_v19 = vpack.c.bf16 %v1609_v18, %v1607_v17  ;;  %v1606_v20 = vld [vmem:[#allocation4 + $0x1e0] sm:$0xff] }
  0x43   :  { %255 = vmatprep.mubr.f32.mxu1 %v5144_v0  ;;  %v3314_v28 = vpack.c.bf16 %v1581_v26, %v1579_v9  ;;  %v4599_v10 = vshrl.u32 %v1439_v8, 7 }
  0x44   :  { %2857 = vmatmul.mubr.msk.f32.gmra.mrb[10].mxu0 %vm105_vm3, %v4042_v34 }
  0x45   :  { %503 = vmatprep.mubr.f32.mxu0 %v5144_v0  ;;  %3315 = vmatprep.subr.bf16.mxu1 %v3314_v28  ;;  %5153 = vst [vmem:[#allocation9_spill] sm:$0xff] %v4599_v10 }
  0x46   :  { %2827 = vmatmul.mubr.msk.f32.gmra.mrb[2].mxu1 %vm105_vm3, %v4016_v31 }
  0x47   :  { %261 = vmatprep.mubr.f32.mxu1 %v5144_v0 }
  0x48   :  { %2858 = vmatmul.mubr.msk.f32.gmra.mrb[12].mxu0 %vm105_vm3, %v4050_v35 }
  0x49   :  { %509 = vmatprep.mubr.f32.mxu0 %v5144_v0 }
  0x4a   :  { %2828 = vmatmul.mubr.msk.f32.gmra.mrb[4].mxu1 %vm105_vm3, %v4026_v32 }
  0x4b   :  { %267 = vmatprep.mubr.f32.mxu1 %v5144_v0 }
  0x4c   :  { %2859 = vmatmul.mubr.msk.f32.gmra.mrb[14].mxu0 %vm105_vm3, %v4058_v36 }
  0x4d   :  { %515 = vmatprep.mubr.f32.mxu0 %v5144_v0 }
  0x4e   :  { %2829 = vmatmul.mubr.msk.f32.gmra.mrb[6].mxu1 %vm105_vm3, %v4034_v33 }
  0x4f   :  { %273 = vmatprep.mubr.f32.mxu1 %v5144_v0 }
  0x50   :  { %2860 = vmatmul.mubr.msk.f32.gmra.mrb[16].mxu0 %vm105_vm3, %v4066_v37 }
  0x51   :  { %521 = vmatprep.mubr.f32.mxu0 %v5144_v0 }
  0x52   :  { %2830 = vmatmul.mubr.msk.f32.gmra.mrb[8].mxu1 %vm105_vm3, %v4042_v34 }
  0x53   :  { %279 = vmatprep.mubr.f32.mxu1 %v5144_v0 }
  0x54   :  { %2861 = vmatmul.mubr.msk.f32.gmra.mrb[18].mxu0 %vm105_vm3, %v4074_v38 }
  0x55   :  { %527 = vmatprep.mubr.f32.mxu0 %v5144_v0 }
  0x56   :  { %2831 = vmatmul.mubr.msk.f32.gmra.mrb[10].mxu1 %vm105_vm3, %v4050_v35 }
  0x57   :  { %285 = vmatprep.mubr.f32.mxu1 %v5144_v0 }
  0x58   :  { %2862 = vmatmul.mubr.msk.f32.gmra.mrb[20].mxu0 %vm105_vm3, %v4082_v39 }
  0x59   :  { %533 = vmatprep.mubr.f32.mxu0 %v5144_v0 }
  0x5a   :  { %2832 = vmatmul.mubr.msk.f32.gmra.mrb[12].mxu1 %vm105_vm3, %v4058_v36 }
  0x5b   :  { %291 = vmatprep.mubr.f32.mxu1 %v5144_v0 }
  0x5c   :  { %2863 = vmatmul.mubr.msk.f32.gmra.mrb[22].mxu0 %vm105_vm3, %v4090_v40 }
  0x5d   :  { %539 = vmatprep.mubr.f32.mxu0 %v5144_v0 }
  0x5e   :  { %2833 = vmatmul.mubr.msk.f32.gmra.mrb[14].mxu1 %vm105_vm3, %v4066_v37 }
  0x5f   :  { %297 = vmatprep.mubr.f32.mxu1 %v5144_v0 }
  0x60   :  { %2864 = vmatmul.mubr.msk.f32.gmra.mrb[24].mxu0 %vm105_vm3, %v4098_v41 }
  0x61   :  { %545 = vmatprep.mubr.f32.mxu0 %v5144_v0 }
  0x62   :  { %2834 = vmatmul.mubr.msk.f32.gmra.mrb[16].mxu1 %vm105_vm3, %v4074_v38 }
  0x63   :  { %303 = vmatprep.mubr.f32.mxu1 %v5144_v0 }
  0x64   :  { %2865 = vmatmul.mubr.msk.f32.gmra.mrb[26].mxu0 %vm105_vm3, %v4106_v42 }
  0x65   :  { %551 = vmatprep.mubr.f32.mxu0 %v5144_v0 }
  0x66   :  { %2835 = vmatmul.mubr.msk.f32.gmra.mrb[18].mxu1 %vm105_vm3, %v4082_v39 }
  0x67   :  { %309 = vmatprep.mubr.f32.mxu1 %v5144_v0 }
  0x68   :  { %2866 = vmatmul.mubr.msk.f32.gmra.mrb[28].mxu0 %vm105_vm3, %v4114_v43 }
  0x69   :  { %557 = vmatprep.mubr.f32.mxu0 %v5144_v0 }
  0x6a   :  { %2836 = vmatmul.mubr.msk.f32.gmra.mrb[20].mxu1 %vm105_vm3, %v4090_v40 }
  0x6b   :  { %315 = vmatprep.mubr.f32.mxu1 %v5144_v0 }
  0x6c   :  { %2867 = vmatmul.mubr.msk.f32.gmra.mrb[30].mxu0 %vm105_vm3, %v4122_v44 }
  0x6d   :  { %563 = vmatprep.mubr.f32.mxu0 %v5144_v0 }
  0x6e   :  { %2837 = vmatmul.mubr.msk.f32.gmra.mrb[22].mxu1 %vm105_vm3, %v4098_v41 }
  0x6f   :  { %321 = vmatprep.mubr.f32.mxu1 %v5144_v0 }
  0x70   :  { %2868 = vmatmul.mubr.msk.f32.gmra.mrb[32].mxu0 %vm105_vm3, %v4130_v45 }
  0x71   :  { %569 = vmatprep.mubr.f32.mxu0 %v5144_v0 }
  0x72   :  { %2838 = vmatmul.mubr.msk.f32.gmra.mrb[24].mxu1 %vm105_vm3, %v4106_v42 }
  0x73   :  { %327 = vmatprep.mubr.f32.mxu1 %v5144_v0 }
  0x74   :  { %2869 = vmatmul.mubr.msk.f32.gmra.mrb[34].mxu0 %vm105_vm3, %v4138_v46 }
  0x75   :  { %575 = vmatprep.mubr.f32.mxu0 %v5144_v0 }
  0x76   :  { %2839 = vmatmul.mubr.msk.f32.gmra.mrb[26].mxu1 %vm105_vm3, %v4114_v43 }
  0x77   :  { %333 = vmatprep.mubr.f32.mxu1 %v5144_v0 }
  0x78   :  { %2870 = vmatmul.mubr.msk.f32.gmra.mrb[36].mxu0 %vm105_vm3, %v4146_v47 }
  0x79   :  { %581 = vmatprep.mubr.f32.mxu0 %v5144_v0 }
  0x7a   :  { %2840 = vmatmul.mubr.msk.f32.gmra.mrb[28].mxu1 %vm105_vm3, %v4122_v44 }
  0x7b   :  { %339 = vmatprep.mubr.f32.mxu1 %v5144_v0 }
  0x7c   :  { %2871 = vmatmul.mubr.msk.f32.gmra.mrb[38].mxu0 %vm105_vm3, %v4154_v48 }
  0x7d   :  { %587 = vmatprep.mubr.f32.mxu0 %v5144_v0 }
  0x7e   :  { %2841 = vmatmul.mubr.msk.f32.gmra.mrb[30].mxu1 %vm105_vm3, %v4130_v45 }
  0x7f   :  { %345 = vmatprep.mubr.f32.mxu1 %v5144_v0 }
  0x80   :  { %2872 = vmatmul.mubr.msk.f32.gmra.mrb[40].mxu0 %vm105_vm3, %v4162_v49 }
  0x81   :  { %593 = vmatprep.mubr.f32.mxu0 %v5144_v0 }
  0x82   :  { %2842 = vmatmul.mubr.msk.f32.gmra.mrb[32].mxu1 %vm105_vm3, %v4138_v46 }
  0x83   :  { %351 = vmatprep.mubr.f32.mxu1 %v5144_v0 }
  0x84   :  { %2873 = vmatmul.mubr.msk.f32.gmra.mrb[42].mxu0 %vm105_vm3, %v4170_v50 }
  0x85   :  { %599 = vmatprep.mubr.f32.mxu0 %v5144_v0 }
  0x86   :  { %2843 = vmatmul.mubr.msk.f32.gmra.mrb[34].mxu1 %vm105_vm3, %v4146_v47 }
  0x87   :  { %357 = vmatprep.mubr.f32.mxu1 %v5144_v0 }
  0x88   :  { %2874 = vmatmul.mubr.msk.f32.gmra.mrb[44].mxu0 %vm105_vm3, %v4178_v51 }
  0x89   :  { %605 = vmatprep.mubr.f32.mxu0 %v5144_v0 }
  0x8a   :  { %2844 = vmatmul.mubr.msk.f32.gmra.mrb[36].mxu1 %vm105_vm3, %v4154_v48 }
  0x8b   :  { %363 = vmatprep.mubr.f32.mxu1 %v5144_v0 }
  0x8c   :  { %2875 = vmatmul.mubr.msk.f32.gmra.mrb[46].mxu0 %vm105_vm3, %v4186_v52 }
  0x8d   :  { %694 = vmatprep.mubr.f32.mxu0 %v5144_v0 }
  0x8e   :  { %2845 = vmatmul.mubr.msk.f32.gmra.mrb[38].mxu1 %vm105_vm3, %v4162_v49 }
  0x8f   :  { %369 = vmatprep.mubr.f32.mxu1 %v5144_v0 }
  0x90   :  { %2878 = vmatmul.mubr.msk.f32.vlgmr.msra.gmra.mrb[0].mxu0 %vm105_vm3, %v4016_v31  ;;  %v1585_v31 = vld [vmem:[#allocation4 + $0x138] sm:$0xff] }
  0x91   :  { %3297 = vmatpush1.bf16.msra.mxu0 %v3296_v57  ;;  %700 = vmatprep.mubr.f32.mxu0 %v5144_v0  ;;  %v3318_v53 = vpack.c.bf16 %v1585_v31, %v1583_v30  ;;  %v1589_v57 = vld [vmem:[#allocation4 + $0x158] sm:$0xff] }
  0x92   :  { %3300 = vmatprep.subr.msk.bf16.mxu0 %vm3990_vm2, %v3298_v58  ;;  %2846 = vmatmul.mubr.msk.f32.gmra.mrb[40].mxu1 %vm105_vm3, %v4170_v50  ;;  %v3320_v58 = vpack.c.bf16 %v1584_v55, %v1582_v54  ;;  %v3322_v59 = vpack.c.bf16 %v1589_v57, %v1587_v56 }
  0x93   :  { %375 = vmatprep.mubr.f32.mxu1 %v5144_v0 }
  0x94   :  { %2879 = vmatmul.mubr.msk.f32.gmra.mrb[2].mxu0 %vm105_vm3, %v4026_v32 }
  0x95   :  { %706 = vmatprep.mubr.f32.mxu0 %v5144_v0  ;;  %3303 = vmatpush1.bf16.msk.msra.mxu0 %vm3990_vm2, %v3301_v63  ;;  %v1593_v63 = vld [vmem:[#allocation4 + $0x178] sm:$0xff] }
  0x96   :  { %3305 = vmatprep.subr.bf16.mxu0 %v3304_v1  ;;  %2847 = vmatmul.mubr.msk.f32.gmra.mrb[42].mxu1 %vm105_vm3, %v4178_v51  ;;  %v3324_v1 = vpack.c.bf16 %v1588_v61, %v1586_v60  ;;  %v3326_v2 = vpack.c.bf16 %v1593_v63, %v1591_v62 }
  0x97   :  { %381 = vmatprep.mubr.f32.mxu1 %v5144_v0 }
  0x98   :  { %2880 = vmatmul.mubr.msk.f32.gmra.mrb[4].mxu0 %vm105_vm3, %v4034_v33 }
  0x99   :  { %712 = vmatprep.mubr.f32.mxu0 %v5144_v0 }
  0x9a   :  { %2848 = vmatmul.mubr.msk.f32.gmra.mrb[44].mxu1 %vm105_vm3, %v4186_v52 }
  0x9b   :  { %387 = vmatprep.mubr.f32.mxu1 %v5144_v0 }
  0x9c   :  { %2881 = vmatmul.mubr.msk.f32.gmra.mrb[6].mxu0 %vm105_vm3, %v4042_v34 }
  0x9d   :  { %718 = vmatprep.mubr.f32.mxu0 %v5144_v0 }
  0x9e   :  { %2849 = vmatmul.mubr.msk.f32.gmra.mrb[46].mxu1 %vm105_vm3, %v4286_v15 }
  0x9f   :  { %1674 = vmatprep.mubr.f32.mxu1 %v5144_v0 }
  0xa0   :  { %2882 = vmatmul.mubr.msk.f32.gmra.mrb[8].mxu0 %vm105_vm3, %v4050_v35 }
  0xa1   :  { %724 = vmatprep.mubr.f32.mxu0 %v5144_v0 }
  0xa4   :  { %2883 = vmatmul.mubr.msk.f32.gmra.mrb[10].mxu0 %vm105_vm3, %v4058_v36 }
  0xa5   :  { %730 = vmatprep.mubr.f32.mxu0 %v5144_v0 }
  0xa8   :  { %2884 = vmatmul.mubr.msk.f32.gmra.mrb[12].mxu0 %vm105_vm3, %v4066_v37 }
  0xa9   :  { %736 = vmatprep.mubr.f32.mxu0 %v5144_v0 }
  0xac   :  { %2885 = vmatmul.mubr.msk.f32.gmra.mrb[14].mxu0 %vm105_vm3, %v4074_v38 }
  0xad   :  { %742 = vmatprep.mubr.f32.mxu0 %v5144_v0 }
  0xb0   :  { %2886 = vmatmul.mubr.msk.f32.gmra.mrb[16].mxu0 %vm105_vm3, %v4082_v39 }
  0xb1   :  { %748 = vmatprep.mubr.f32.mxu0 %v5144_v0 }
  0xb4   :  { %2887 = vmatmul.mubr.msk.f32.gmra.mrb[18].mxu0 %vm105_vm3, %v4090_v40 }
  0xb5   :  { %754 = vmatprep.mubr.f32.mxu0 %v5144_v0 }
  0xb8   :  { %2888 = vmatmul.mubr.msk.f32.gmra.mrb[20].mxu0 %vm105_vm3, %v4098_v41 }
  0xb9   :  { %760 = vmatprep.mubr.f32.mxu0 %v5144_v0 }
  0xbc   :  { %2889 = vmatmul.mubr.msk.f32.gmra.mrb[22].mxu0 %vm105_vm3, %v4106_v42 }
  0xbd   :  { %766 = vmatprep.mubr.f32.mxu0 %v5144_v0 }
  0xc0   :  { %2890 = vmatmul.mubr.msk.f32.gmra.mrb[24].mxu0 %vm105_vm3, %v4114_v43 }
  0xc1   :  { %772 = vmatprep.mubr.f32.mxu0 %v5144_v0 }
  0xc4   :  { %2891 = vmatmul.mubr.msk.f32.gmra.mrb[26].mxu0 %vm105_vm3, %v4122_v44 }
  0xc5   :  { %778 = vmatprep.mubr.f32.mxu0 %v5144_v0 }
  0xc8   :  { %2892 = vmatmul.mubr.msk.f32.gmra.mrb[28].mxu0 %vm105_vm3, %v4130_v45 }
  0xc9   :  { %784 = vmatprep.mubr.f32.mxu0 %v5144_v0 }
  0xcc   :  { %2893 = vmatmul.mubr.msk.f32.gmra.mrb[30].mxu0 %vm105_vm3, %v4138_v46 }
  0xcd   :  { %790 = vmatprep.mubr.f32.mxu0 %v5144_v0 }
  0xd0   :  { %2894 = vmatmul.mubr.msk.f32.gmra.mrb[32].mxu0 %vm105_vm3, %v4146_v47 }
  0xd1   :  { %796 = vmatprep.mubr.f32.mxu0 %v5144_v0 }
  0xd4   :  { %2895 = vmatmul.mubr.msk.f32.gmra.mrb[34].mxu0 %vm105_vm3, %v4154_v48 }
  0xd5   :  { %802 = vmatprep.mubr.f32.mxu0 %v5144_v0 }
  0xd8   :  { %2896 = vmatmul.mubr.msk.f32.gmra.mrb[36].mxu0 %vm105_vm3, %v4162_v49 }
  0xd9   :  { %808 = vmatprep.mubr.f32.mxu0 %v5144_v0 }
  0xdc   :  { %2897 = vmatmul.mubr.msk.f32.gmra.mrb[38].mxu0 %vm105_vm3, %v4170_v50 }
  0xdd   :  { %814 = vmatprep.mubr.f32.mxu0 %v5144_v0 }
  0xe0   :  { %2898 = vmatmul.mubr.msk.f32.gmra.mrb[40].mxu0 %vm105_vm3, %v4178_v51 }
  0xe1   :  { %820 = vmatprep.mubr.f32.mxu0 %v5144_v0 }
  0xe4   :  { %2899 = vmatmul.mubr.msk.f32.gmra.mrb[42].mxu0 %vm105_vm3, %v4186_v52 }
  0xe5   :  { %826 = vmatprep.mubr.f32.mxu0 %v5144_v0 }
  0xe8   :  { %2900 = vmatmul.mubr.msk.f32.gmra.mrb[44].mxu0 %vm105_vm3, %v4286_v15 }
  0xe9   :  { %832 = vmatprep.mubr.f32.mxu0 %v5144_v0 }
  0xec   :  { %2901 = vmatmul.mubr.msk.f32.gmra.mrb[46].mxu0 %vm105_vm3, %v4297_v16 }
  0xed   :  { %969 = vmatprep.mubr.f32.mxu0 %v5144_v0 }
  0xf0   :  { %2904 = vmatmul.mubr.msk.f32.vlgmr.msra.gmra.mrb[0].mxu0 %vm105_vm3, %v4026_v32  ;;  %v3316_v32 = vpack.c.bf16 %v1580_v29, %v1578_v27 }
  0xf1   :  { %3307 = vmatpush1.bf16.msra.mxu0 %v3306_v21  ;;  %975 = vmatprep.mubr.f32.mxu0 %v5144_v0  ;;  %v1608_v21 = vld [vmem:[#allocation4 + $0x1f0] sm:$0xff] }
  0xf2   :  { %3310 = vmatprep.subr.msk.bf16.mxu0 %vm3990_vm2, %v3308_v22  ;;  %3317 = vmatpush1.bf16.msra.mxu1 %v3316_v32  ;;  %v3344_v23 = vpack.c.bf16 %v1608_v21, %v1606_v20 }
  0xf3   :  { %3319 = vmatprep.subr.bf16.mxu1 %v3318_v53 }
  0xf4   :  { %2905 = vmatmul.mubr.msk.f32.gmra.mrb[2].mxu0 %vm105_vm3, %v4034_v33 }
  0xf5   :  { %981 = vmatprep.mubr.f32.mxu0 %v5144_v0  ;;  %3313 = vmatpush1.bf16.msk.msra.mxu0 %vm3990_vm2, %v3311_v25 }
  0xf6   :  { %3321 = vmatpush1.bf16.msra.mxu1 %v3320_v58  ;;  %v1546_v58 = vld [vmem:[#allocation4 + $0x8] sm:$0xff] }
  0xf7   :  { %3323 = vmatprep.subr.bf16.mxu1 %v3322_v59  ;;  %v1548_v59 = vld [vmem:[#allocation4 + $0x18] sm:$0xff] }
  0xf8   :  { %2906 = vmatmul.mubr.msk.f32.gmra.mrb[4].mxu0 %vm105_vm3, %v4042_v34  ;;  %v3346_v60 = vpack.c.bf16 %v1548_v59, %v1546_v58 }
  0xf9   :  { %987 = vmatprep.mubr.f32.mxu0 %v5144_v0 }
  0xfa   :  { %3325 = vmatpush1.bf16.msra.mxu1 %v3324_v1 }
  0xfb   :  { %3327 = vmatprep.subr.bf16.mxu1 %v3326_v2 }
  0xfc   :  { %2907 = vmatmul.mubr.msk.f32.gmra.mrb[6].mxu0 %vm105_vm3, %v4050_v35 }
  0xfd   :  { %993 = vmatprep.mubr.f32.mxu0 %v5144_v0 }
  0xfe   :  { %3329 = vmatpush1.bf16.msra.mxu1 %v3328_v5 }
 0x100   :  { %2908 = vmatmul.mubr.msk.f32.gmra.mrb[8].mxu0 %vm105_vm3, %v4058_v36 }
 0x101   :  { %999 = vmatprep.mubr.f32.mxu0 %v5144_v0 }
 0x104   :  { %2909 = vmatmul.mubr.msk.f32.gmra.mrb[10].mxu0 %vm105_vm3, %v4066_v37 }
 0x105   :  { %1005 = vmatprep.mubr.f32.mxu0 %v5144_v0 }
 0x108   :  { %2910 = vmatmul.mubr.msk.f32.gmra.mrb[12].mxu0 %vm105_vm3, %v4074_v38 }
 0x109   :  { %1011 = vmatprep.mubr.f32.mxu0 %v5144_v0 }
 0x10c   :  { %2911 = vmatmul.mubr.msk.f32.gmra.mrb[14].mxu0 %vm105_vm3, %v4082_v39 }
 0x10d   :  { %1017 = vmatprep.mubr.f32.mxu0 %v5144_v0 }
 0x110   :  { %2912 = vmatmul.mubr.msk.f32.gmra.mrb[16].mxu0 %vm105_vm3, %v4090_v40 }
 0x111   :  { %1023 = vmatprep.mubr.f32.mxu0 %v5144_v0 }
 0x114   :  { %2913 = vmatmul.mubr.msk.f32.gmra.mrb[18].mxu0 %vm105_vm3, %v4098_v41 }
 0x115   :  { %1029 = vmatprep.mubr.f32.mxu0 %v5144_v0 }
 0x118   :  { %2914 = vmatmul.mubr.msk.f32.gmra.mrb[20].mxu0 %vm105_vm3, %v4106_v42 }
 0x119   :  { %1035 = vmatprep.mubr.f32.mxu0 %v5144_v0 }
 0x11c   :  { %2915 = vmatmul.mubr.msk.f32.gmra.mrb[22].mxu0 %vm105_vm3, %v4114_v43 }
 0x11d   :  { %1041 = vmatprep.mubr.f32.mxu0 %v5144_v0 }
 0x120   :  { %2916 = vmatmul.mubr.msk.f32.gmra.mrb[24].mxu0 %vm105_vm3, %v4122_v44 }
 0x121   :  { %1047 = vmatprep.mubr.f32.mxu0 %v5144_v0 }
 0x124   :  { %2917 = vmatmul.mubr.msk.f32.gmra.mrb[26].mxu0 %vm105_vm3, %v4130_v45 }
 0x125   :  { %1053 = vmatprep.mubr.f32.mxu0 %v5144_v0 }
 0x128   :  { %2918 = vmatmul.mubr.msk.f32.gmra.mrb[28].mxu0 %vm105_vm3, %v4138_v46 }
 0x129   :  { %1059 = vmatprep.mubr.f32.mxu0 %v5144_v0 }
 0x12c   :  { %2919 = vmatmul.mubr.msk.f32.gmra.mrb[30].mxu0 %vm105_vm3, %v4146_v47 }
 0x12d   :  { %1065 = vmatprep.mubr.f32.mxu0 %v5144_v0 }
 0x130   :  { %2920 = vmatmul.mubr.msk.f32.gmra.mrb[32].mxu0 %vm105_vm3, %v4154_v48 }
 0x131   :  { %1071 = vmatprep.mubr.f32.mxu0 %v5144_v0 }
 0x134   :  { %2921 = vmatmul.mubr.msk.f32.gmra.mrb[34].mxu0 %vm105_vm3, %v4162_v49 }
 0x135   :  { %1077 = vmatprep.mubr.f32.mxu0 %v5144_v0 }
 0x138   :  { %2922 = vmatmul.mubr.msk.f32.gmra.mrb[36].mxu0 %vm105_vm3, %v4170_v50 }
 0x139   :  { %1083 = vmatprep.mubr.f32.mxu0 %v5144_v0 }
 0x13c   :  { %2923 = vmatmul.mubr.msk.f32.gmra.mrb[38].mxu0 %vm105_vm3, %v4178_v51 }
 0x13d   :  { %1089 = vmatprep.mubr.f32.mxu0 %v5144_v0 }
 0x140   :  { %2924 = vmatmul.mubr.msk.f32.gmra.mrb[40].mxu0 %vm105_vm3, %v4186_v52 }
 0x141   :  { %1095 = vmatprep.mubr.f32.mxu0 %v5144_v0 }
 0x144   :  { %2925 = vmatmul.mubr.msk.f32.gmra.mrb[42].mxu0 %vm105_vm3, %v4286_v15 }
 0x145   :  { %1101 = vmatprep.mubr.f32.mxu0 %v5144_v0 }
 0x148   :  { %2926 = vmatmul.mubr.msk.f32.gmra.mrb[44].mxu0 %vm105_vm3, %v4297_v16 }
 0x149   :  { %1107 = vmatprep.mubr.f32.mxu0 %v5144_v0 }
 0x14c   :  { %2927 = vmatmul.mubr.msk.f32.gmra.mrb[46].mxu0 %vm105_vm3, %v86_v6 }
 0x14d   :  { %1244 = vmatprep.mubr.f32.mxu0 %v5144_v0 }
 0x150   :  { %2930 = vmatmul.mubr.msk.f32.vlgmr.msra.gmra.mrb[0].mxu0 %vm105_vm3, %v4034_v33  ;;  %v4494_v33 = vpop.f32.mrb[0].mxu1 }
 0x151   :  { %1250 = vmatprep.mubr.f32.mxu0 %v5144_v0 }
 0x154   :  { %2931 = vmatmul.mubr.msk.f32.gmra.mrb[2].mxu0 %vm105_vm3, %v4042_v34  ;;  %v4496_v34 = vpop.f32.mrb[1].mxu1 }
 0x155   :  { %1256 = vmatprep.mubr.f32.mxu0 %v5144_v0 }
 0x158   :  { %2932 = vmatmul.mubr.msk.f32.gmra.mrb[4].mxu0 %vm105_vm3, %v4050_v35  ;;  %v4501_v35 = vpop.f32.mrb[2].mxu1 }
 0x159   :  { %1262 = vmatprep.mubr.f32.mxu0 %v5144_v0 }
 0x15c   :  { %2933 = vmatmul.mubr.msk.f32.gmra.mrb[6].mxu0 %vm105_vm3, %v4058_v36  ;;  %v4503_v36 = vpop.f32.mrb[3].mxu1 }
 0x15d   :  { %1268 = vmatprep.mubr.f32.mxu0 %v5144_v0 }
 0x160   :  { %2934 = vmatmul.mubr.msk.f32.gmra.mrb[8].mxu0 %vm105_vm3, %v4066_v37  ;;  %v1595_v37 = vld [vmem:[#allocation4 + $0x188] sm:$0xff] }
 0x161   :  { %1274 = vmatprep.mubr.f32.mxu0 %v5144_v0 }
 0x164   :  { %2935 = vmatmul.mubr.msk.f32.gmra.mrb[10].mxu0 %vm105_vm3, %v4074_v38  ;;  %v1597_v38 = vld [vmem:[#allocation4 + $0x198] sm:$0xff] }
 0x165   :  { %1280 = vmatprep.mubr.f32.mxu0 %v5144_v0 }
 0x168   :  { %2936 = vmatmul.mubr.msk.f32.gmra.mrb[12].mxu0 %vm105_vm3, %v4082_v39  ;;  %v87_v39 = vld [vmem:[%s5133_s0 + $0xd8] sm:$0xff] }
 0x169   :  { %1286 = vmatprep.mubr.f32.mxu0 %v5144_v0 }
 0x16c   :  { %2937 = vmatmul.mubr.msk.f32.gmra.mrb[14].mxu0 %vm105_vm3, %v4090_v40  ;;  %v3330_v40 = vpack.c.bf16 %v1597_v38, %v1595_v37 }
 0x16d   :  { %1292 = vmatprep.mubr.f32.mxu0 %v5144_v0 }
 0x16e   :  { %3331 = vmatprep.subr.bf16.mxu1 %v3330_v40 }
 0x170   :  { %2938 = vmatmul.mubr.msk.f32.gmra.mrb[16].mxu0 %vm105_vm3, %v4098_v41  ;;  %v1594_v41 = vld [vmem:[#allocation4 + $0x180] sm:$0xff] }
 0x171   :  { %1298 = vmatprep.mubr.f32.mxu0 %v5144_v0 }
 0x174   :  { %2939 = vmatmul.mubr.msk.f32.gmra.mrb[18].mxu0 %vm105_vm3, %v4106_v42  ;;  %v1596_v42 = vld [vmem:[#allocation4 + $0x190] sm:$0xff] }
 0x175   :  { %1304 = vmatprep.mubr.f32.mxu0 %v5144_v0 }
 0x178   :  { %2940 = vmatmul.mubr.msk.f32.gmra.mrb[20].mxu0 %vm105_vm3, %v4114_v43  ;;  %v3332_v43 = vpack.c.bf16 %v1596_v42, %v1594_v41 }
 0x179   :  { %1310 = vmatprep.mubr.f32.mxu0 %v5144_v0 }
 0x17a   :  { %3333 = vmatpush1.bf16.msra.mxu1 %v3332_v43 }
 0x17c   :  { %2941 = vmatmul.mubr.msk.f32.gmra.mrb[22].mxu0 %vm105_vm3, %v4122_v44  ;;  %v4510_v44 = vpop.f32.mrb[4].mxu1 }
 0x17d   :  { %1316 = vmatprep.mubr.f32.mxu0 %v5144_v0 }
 0x180   :  { %2942 = vmatmul.mubr.msk.f32.gmra.mrb[24].mxu0 %vm105_vm3, %v4130_v45  ;;  %v4512_v45 = vpop.f32.mrb[5].mxu1 }
 0x181   :  { %1322 = vmatprep.mubr.f32.mxu0 %v5144_v0 }
 0x184   :  { %2943 = vmatmul.mubr.msk.f32.gmra.mrb[26].mxu0 %vm105_vm3, %v4138_v46  ;;  %v1599_v46 = vld [vmem:[#allocation4 + $0x1a8] sm:$0xff] }
 0x185   :  { %1328 = vmatprep.mubr.f32.mxu0 %v5144_v0 }
 0x188   :  { %2944 = vmatmul.mubr.msk.f32.gmra.mrb[28].mxu0 %vm105_vm3, %v4146_v47  ;;  %v1601_v47 = vld [vmem:[#allocation4 + $0x1b8] sm:$0xff] }
 0x189   :  { %1334 = vmatprep.mubr.f32.mxu0 %v5144_v0 }
 0x18c   :  { %2945 = vmatmul.mubr.msk.f32.gmra.mrb[30].mxu0 %vm105_vm3, %v4154_v48  ;;  %v3334_v48 = vpack.c.bf16 %v1601_v47, %v1599_v46 }
 0x18d   :  { %1340 = vmatprep.mubr.f32.mxu0 %v5144_v0 }
 0x18e   :  { %3335 = vmatprep.subr.bf16.mxu1 %v3334_v48 }
 0x190   :  { %2946 = vmatmul.mubr.msk.f32.gmra.mrb[32].mxu0 %vm105_vm3, %v4162_v49  ;;  %v1598_v49 = vld [vmem:[#allocation4 + $0x1a0] sm:$0xff] }
 0x191   :  { %1346 = vmatprep.mubr.f32.mxu0 %v5144_v0 }
 0x194   :  { %2947 = vmatmul.mubr.msk.f32.gmra.mrb[34].mxu0 %vm105_vm3, %v4170_v50  ;;  %v1600_v50 = vld [vmem:[#allocation4 + $0x1b0] sm:$0xff] }
 0x195   :  { %1352 = vmatprep.mubr.f32.mxu0 %v5144_v0 }
 0x198   :  { %2948 = vmatmul.mubr.msk.f32.gmra.mrb[36].mxu0 %vm105_vm3, %v4178_v51  ;;  %v4515_v51 = vpop.f32.mrb[6].mxu1 }
 0x199   :  { %1358 = vmatprep.mubr.f32.mxu0 %v5144_v0  ;;  %v4517_v7 = vpop.f32.mrb[7].mxu1 }
 0x19a   :  { %v4519_v14 = vpop.f32.mrb[8].mxu1 }
 0x19c   :  { %2949 = vmatmul.mubr.msk.f32.gmra.mrb[38].mxu0 %vm105_vm3, %v4186_v52  ;;  %v3336_v52 = vpack.c.bf16 %v1600_v50, %v1598_v49 }
 0x19d   :  { %1364 = vmatprep.mubr.f32.mxu0 %v5144_v0 }
 0x19e   :  { %3337 = vmatpush1.bf16.msra.mxu1 %v3336_v52 }
 0x19f   :  { %3339 = vmatprep.subr.bf16.mxu1 %v3338_v11  ;;  %v5143_v11 = vsub.s32 0, %v4599_v10 }
 0x1a0   :  { %2950 = vmatmul.mubr.msk.f32.gmra.mrb[40].mxu0 %vm105_vm3, %v4286_v15  ;;  %v3340_v15 = vpack.c.bf16 %v1604_v13, %v1602_v12  ;;  %v1437_v12 = vld [vmem:[%s5135_s2] sm:$0x3]  ;;  %v5148_v13 = vsub.s32 1, %v4599_v10 }
 0x1a1   :  { %1370 = vmatprep.mubr.f32.mxu0 %v5144_v0 }
 0x1a2   :  { %3341 = vmatpush1.bf16.msra.mxu1 %v3340_v15  ;;  %v4608_v15 = vrot.slane %v1437_v12, %v5143_v11  ;;  %v4612_v18 = vrot.slane %v1437_v12, %v5148_v13 }
 0x1a3   :  { %3343 = vmatprep.subr.bf16.mxu1 %v3342_v19 }
 0x1a4   :  { %2951 = vmatmul.mubr.msk.f32.gmra.mrb[42].mxu0 %vm105_vm3, %v4297_v16  ;;  %v4521_v16 = vpop.f32.mrb[9].mxu1 }
 0x1a5   :  { %1376 = vmatprep.mubr.f32.mxu0 %v5144_v0  ;;  %v4523_v22 = vpop.f32.mrb[10].mxu1 }
 0x1a6   :  { %v4525_v24 = vpop.f32.mrb[11].mxu1  ;;  %3345 = vmatpush1.bf16.msra.mxu1 %v3344_v23 }
 0x1a7   :  { %v4527_v25 = vpop.f32.mrb[12].mxu1  ;;  %3347 = vmatprep.subr.bf16.mxu1 %v3346_v60 }
 0x1a8   :  { %2952 = vmatmul.mubr.msk.f32.gmra.mrb[44].mxu0 %vm105_vm3, %v86_v6  ;;  %v4529_v9 = vpop.f32.mrb[13].mxu1 }
 0x1a9   :  { %1382 = vmatprep.mubr.f32.mxu0 %v5144_v0  ;;  %v4531_v26 = vpop.f32.mrb[14].mxu1 }
 0x1aa   :  { %v4533_v27 = vpop.f32.mrb[15].mxu1 }
 0x1ab   :  { %v4535_v28 = vpop.f32.mrb[16].mxu1 }
 0x1ac   :  { %2953 = vmatmul.mubr.msk.f32.gmra.mrb[46].mxu0 %vm105_vm3, %v87_v39  ;;  %v4537_v29 = vpop.f32.mrb[17].mxu1 }
 0x1ad   :  { %v4539_v30 = vpop.f32.mrb[18].mxu1 }
 0x1ae   :  { %v4541_v31 = vpop.f32.mrb[19].mxu1 }
 0x1af   :  { %v4543_v32 = vpop.f32.mrb[20].mxu1 }
 0x1b0   :  { %v4545_v53 = vpop.f32.mrb[21].mxu1 }
 0x1b1   :  { %v4547_v54 = vpop.f32.mrb[22].mxu1 }
 0x1b2   :  { %v4549_v55 = vpop.f32.mrb[23].mxu1 }
 0x1b3   :  { %v4551_v56 = vpop.f32.mrb[24].mxu1 }
 0x1b4   :  { %v4553_v57 = vpop.f32.mrb[25].mxu1 }
 0x1b5   :  { %v4555_v61 = vpop.f32.mrb[26].mxu1 }
 0x1b6   :  { %v4557_v62 = vpop.f32.mrb[27].mxu1 }
 0x1b7   :  { %v4559_v63 = vpop.f32.mrb[28].mxu1 }
 0x1b8   :  { %v4561_v1 = vpop.f32.mrb[29].mxu1 }
 0x1b9   :  { %v4563_v2 = vpop.f32.mrb[30].mxu1 }
 0x1ba   :  { %v4565_v3 = vpop.f32.mrb[31].mxu1 }
 0x1bb   :  { %v4567_v4 = vpop.f32.mrb[32].mxu1 }
 0x1bc   :  { %v4569_v5 = vpop.f32.mrb[33].mxu1 }
 0x1bd   :  { %v4571_v6 = vpop.f32.mrb[34].mxu1 }
 0x1be   :  { %v4573_v37 = vpop.f32.mrb[35].mxu1 }
 0x1bf   :  { %v4575_v38 = vpop.f32.mrb[36].mxu1 }
 0x1c0   :  { %v4577_v39 = vpop.f32.mrb[37].mxu1 }
 0x1c1   :  { %v4579_v40 = vpop.f32.mrb[38].mxu1 }
 0x1c2   :  { %v4581_v41 = vpop.f32.mrb[39].mxu1 }
 0x1c3   :  { %v4583_v42 = vpop.f32.mrb[40].mxu1 }
 0x1c4   :  { %v4585_v43 = vpop.f32.mrb[41].mxu1 }
 0x1c5   :  { %v4587_v46 = vpop.f32.mrb[42].mxu1 }
 0x1c6   :  { %v4589_v47 = vpop.f32.mrb[43].mxu1 }
 0x1c7   :  { %v4591_v48 = vpop.f32.mrb[44].mxu1 }
 0x1c8   :  { %v4593_v49 = vpop.f32.mrb[45].mxu1 }
 0x1c9   :  { %v4595_v50 = vpop.f32.mrb[46].mxu1 }
 0x1ca   :  { %v4597_v52 = vpop.f32.mrb[47].mxu1 }
 0x1cb   :  { %5152 = vst [vmem:[#allocation8_spill] sm:$0xff] %v4597_v52 }
 0x223   :  { %v1246_v17 = vpop.f32.mrb[0].mxu0 }
 0x224   :  { %v3594_v19 = vadd.f32 %v1246_v17, %v4494_v33  ;;  %v1248_v20 = vpop.f32.mrb[1].mxu0 }
 0x225   :  { %v3595_v21 = vadd.f32 %v1248_v20, %v4496_v34 }
 0x226   :  { %v1449_v23 = vadd.f32 %v3594_v19, %v4608_v15 }
 0x227   :  { %v1450_v58 = vadd.f32 %v3595_v21, %v4612_v18  ;;  %v1252_v59 = vpop.f32.mrb[2].mxu0 }
 0x228   :  { %v3596_v60 = vadd.f32 %v1252_v59, %v4501_v35  ;;  %v1254_v8 = vpop.f32.mrb[3].mxu0 }
 0x229   :  { %v1497_v11 = vmax.f32 %v1449_v23, %v1450_v58  ;;  %v3597_v0 = vadd.f32 %v1254_v8, %v4503_v36 }
 0x22a   :  { %v1451_v10 = vadd.f32 %v3596_v60, %v4608_v15 }
 0x22b   :  { %v1452_v12 = vadd.f32 %v3597_v0, %v4612_v18  ;;  %v1258_v13 = vpop.f32.mrb[4].mxu0 }
 0x22c   :  { %v3598_v33 = vadd.f32 %v1258_v13, %v4510_v44  ;;  %v1260_v17 = vpop.f32.mrb[5].mxu0 }
 0x22d   :  { %v1498_v34 = vmax.f32 %v1451_v10, %v1452_v12  ;;  %v3599_v19 = vadd.f32 %v1260_v17, %v4512_v45  ;;  %v1545_v12 = vld [vmem:[#allocation4] sm:$0xff] }
 0x22e   :  { %v1453_v20 = vadd.f32 %v3598_v33, %v4608_v15  ;;  %v1547_v33 = vld [vmem:[#allocation4 + $0x10] sm:$0xff] }
 0x22f   :  { %v4625_v21 = vmax.f32 %v1497_v11, %v1498_v34  ;;  %v1454_v35 = vadd.f32 %v3599_v19, %v4612_v18  ;;  %v1264_v23 = vpop.f32.mrb[6].mxu0  ;;  %v1552_v34 = vld [vmem:[#allocation4 + $0x38] sm:$0xff] }
 0x230   :  { %v3600_v36 = vadd.f32 %v1264_v23, %v4515_v51  ;;  %v1266_v58 = vpop.f32.mrb[7].mxu0  ;;  %v1550_v51 = vld [vmem:[#allocation4 + $0x28] sm:$0xff] }
 0x231   :  { %v1499_v59 = vmax.f32 %v1453_v20, %v1454_v35  ;;  %v3601_v0 = vadd.f32 %v1266_v58, %v4517_v7 }
 0x232   :  { %v1455_v60 = vadd.f32 %v3600_v36, %v4608_v15  ;;  %v3348_v36 = vpack.c.bf16 %v1547_v33, %v1545_v12  ;;  %v5154_v12 = vmov 0.0  }
 0x233   :  { %v1456_v44 = vadd.f32 %v3601_v0, %v4612_v18  ;;  %v1270_v10 = vpop.f32.mrb[8].mxu0  ;;  %v3350_v0 = vpack.c.bf16 %v1552_v34, %v1550_v51  ;;  %v1553_v34 = vld [vmem:[#allocation4 + $0x40] sm:$0xff] }
 0x234   :  { %v3602_v45 = vadd.f32 %v1270_v10, %v4519_v14  ;;  %v1272_v13 = vpop.f32.mrb[9].mxu0 }
 0x235   :  { %v1500_v8 = vmax.f32 %v1455_v60, %v1456_v44  ;;  %v3603_v11 = vadd.f32 %v1272_v13, %v4521_v16  ;;  %v1549_v60 = vld [vmem:[#allocation4 + $0x20] sm:$0xff]  ;;  %v1551_v44 = vld [vmem:[#allocation4 + $0x30] sm:$0xff] }
 0x236   :  { %v1457_v17 = vadd.f32 %v3602_v45, %v4608_v15  ;;  %v1554_v45 = vld [vmem:[#allocation4 + $0x48] sm:$0xff] }
 0x237   :  { %v4635_v19 = vmax.f32 %v1499_v59, %v1500_v8  ;;  %v1458_v7 = vadd.f32 %v3603_v11, %v4612_v18  ;;  %v1276_v20 = vpop.f32.mrb[10].mxu0  ;;  %v1556_v59 = vld [vmem:[#allocation4 + $0x58] sm:$0xff] }
 0x238   :  { %v3604_v35 = vadd.f32 %v1276_v20, %v4523_v22  ;;  %v1278_v23 = vpop.f32.mrb[11].mxu0  ;;  %v3354_v51 = vpack.c.bf16 %v1556_v59, %v1554_v45  ;;  %v1559_v45 = vld [vmem:[#allocation4 + $0x70] sm:$0xff] }
 0x239   :  { %v5149_v14 = vmax.f32 %v4635_v19, 0.0  ;;  %v1501_v58 = vmax.f32 %v1457_v17, %v1458_v7  ;;  %v3605_v16 = vadd.f32 %v1278_v23, %v4525_v24  ;;  %v3352_v24 = vpack.c.bf16 %v1551_v44, %v1549_v60  ;;  %v1555_v7 = vld [vmem:[#allocation4 + $0x50] sm:$0xff]  ;;  %v1560_v23 = vld [vmem:[#allocation4 + $0x78] sm:$0xff] }
 0x23a   :  { %v1459_v10 = vadd.f32 %v3604_v35, %v4608_v15  ;;  %v1558_v35 = vld [vmem:[#allocation4 + $0x68] sm:$0xff] }
 0x23b   :  { %v1460_v13 = vadd.f32 %v3605_v16, %v4612_v18  ;;  %v1282_v8 = vpop.f32.mrb[12].mxu0  ;;  %1675 = vmatmul.mubr.f32.vlgmr.msra.gmra.mrb[48].mxu1 %v5149_v14  ;;  %v3358_v44 = vpack.c.bf16 %v1560_v23, %v1558_v35 }
 0x23c   :  { %v3606_v22 = vadd.f32 %v1282_v8, %v4527_v25  ;;  %v1284_v11 = vpop.f32.mrb[13].mxu0  ;;  %1680 = vmatprep.mubr.f32.mxu1 %v5154_v12  ;;  %3349 = vmatpush1.bf16.msra.mxu1 %v3348_v36  ;;  %v3356_v36 = vpack.c.bf16 %v1555_v7, %v1553_v34  ;;  %v1566_v7 = vld [vmem:[#allocation4 + $0xa8] sm:$0xff] }
 0x23d   :  { %v1502_v33 = vmax.f32 %v1459_v10, %v1460_v13  ;;  %v3607_v17 = vadd.f32 %v1284_v11, %v4529_v9  ;;  %3351 = vmatprep.subr.bf16.mxu1 %v3350_v0  ;;  %v1557_v10 = vld [vmem:[#allocation4 + $0x60] sm:$0xff]  ;;  %v1562_v13 = vld [vmem:[#allocation4 + $0x88] sm:$0xff] }
 0x23e   :  { %v1461_v20 = vadd.f32 %v3606_v22, %v4608_v15  ;;  %v1564_v22 = vld [vmem:[#allocation4 + $0x98] sm:$0xff] }
 0x23f   :  { %v1462_v16 = vadd.f32 %v3607_v17, %v4612_v18  ;;  %v1288_v14 = vpop.f32.mrb[14].mxu0  ;;  %v1523_v25 = vmax.f32 %v1501_v58, %v1502_v33  ;;  %v3362_v33 = vpack.c.bf16 %v1564_v22, %v1562_v13  ;;  %v1561_v17 = vld [vmem:[#allocation4 + $0x80] sm:$0xff]  ;;  %v1572_v13 = vld [vmem:[#allocation4 + $0xd8] sm:$0xff] }
 0x240   :  { %v3608_v8 = vadd.f32 %v1288_v14, %v4531_v26  ;;  %v1290_v52 = vpop.f32.mrb[15].mxu0  ;;  %3353 = vmatpush1.bf16.msra.mxu1 %v3352_v24 }
 0x241   :  { %v1503_v60 = vmax.f32 %v1461_v20, %v1462_v16  ;;  %v3609_v9 = vadd.f32 %v1290_v52, %v4533_v27  ;;  %v4652_v0 = vmax.f32 %v1523_v25, 0.0  ;;  %3355 = vmatprep.subr.bf16.mxu1 %v3354_v51  ;;  %v3360_v27 = vpack.c.bf16 %v1559_v45, %v1557_v10  ;;  %v1563_v51 = vld [vmem:[#allocation4 + $0x90] sm:$0xff]  ;;  %v1568_v20 = vld [vmem:[#allocation4 + $0xb8] sm:$0xff]  ;;  %v1565_v10 = vld [vmem:[#allocation4 + $0xa0] sm:$0xff] }
 0x242   :  { %v1463_v59 = vadd.f32 %v3608_v8, %v4608_v15  ;;  %v3364_v8 = vpack.c.bf16 %v1563_v51, %v1561_v17  ;;  %v1567_v45 = vld [vmem:[#allocation4 + $0xb0] sm:$0xff]  ;;  %v1574_v17 = vld [vmem:[#allocation4 + $0xe8] sm:$0xff]  ;;  %v1576_v51 = vld [vmem:[#allocation4 + $0xf8] sm:$0xff] }
 0x243   :  { %v1464_v58 = vadd.f32 %v3609_v9, %v4612_v18  ;;  %v1294_v11 = vpop.f32.mrb[16].mxu0  ;;  %1681 = vmatmul.mubr.f32.gmra.mrb[50].mxu1 %v4652_v0 }
 0x244   :  { %v3610_v26 = vadd.f32 %v1294_v11, %v4535_v28  ;;  %v1296_v14 = vpop.f32.mrb[17].mxu0  ;;  %1686 = vmatprep.mubr.f32.mxu1 %v5154_v12  ;;  %3357 = vmatpush1.bf16.msra.mxu1 %v3356_v36 }
 0x245   :  { %v1504_v52 = vmax.f32 %v1463_v59, %v1464_v58  ;;  %v3611_v24 = vadd.f32 %v1296_v14, %v4537_v29  ;;  %3359 = vmatprep.subr.bf16.mxu1 %v3358_v44  ;;  %v3366_v44 = vpack.c.bf16 %v1568_v20, %v1566_v7 }
 0x246   :  { %v1465_v34 = vadd.f32 %v3610_v26, %v4608_v15 }
 0x247   :  { %v1524_v35 = vmax.f32 %v1503_v60, %v1504_v52  ;;  %v1466_v23 = vadd.f32 %v3611_v24, %v4612_v18  ;;  %v1300_v28 = vpop.f32.mrb[18].mxu0  ;;  %v1570_v60 = vld [vmem:[#allocation4 + $0xc8] sm:$0xff]  ;;  %v1569_v52 = vld [vmem:[#allocation4 + $0xc0] sm:$0xff]  ;;  %v1571_v24 = vld [vmem:[#allocation4 + $0xd0] sm:$0xff] }
 0x248   :  { %v3612_v16 = vadd.f32 %v1300_v28, %v4539_v30  ;;  %v1302_v25 = vpop.f32.mrb[19].mxu0  ;;  %3361 = vmatpush1.bf16.msra.mxu1 %v3360_v27  ;;  %v3370_v27 = vpack.c.bf16 %v1572_v13, %v1570_v60 }
 0x249   :  { %v4663_v36 = vmax.f32 %v1524_v35, 0.0  ;;  %v1505_v29 = vmax.f32 %v1465_v34, %v1466_v23  ;;  %v3613_v9 = vadd.f32 %v1302_v25, %v4541_v31  ;;  %3363 = vmatprep.subr.bf16.mxu1 %v3362_v33  ;;  %v3368_v31 = vpack.c.bf16 %v1567_v45, %v1565_v10  ;;  %v1840_v10 = vld [vmem:[#allocation4 + $0x218] sm:$0xff] }
 0x24a   :  { %v1467_v59 = vadd.f32 %v3612_v16, %v4608_v15  ;;  %v3372_v23 = vpack.c.bf16 %v1571_v24, %v1569_v52  ;;  %v3374_v25 = vpack.c.bf16 %v1576_v51, %v1574_v17 }
 0x24b   :  { %v1468_v22 = vadd.f32 %v3613_v9, %v4612_v18  ;;  %v1306_v58 = vpop.f32.mrb[20].mxu0  ;;  %1687 = vmatmul.mubr.f32.gmra.mrb[52].mxu1 %v4663_v36  ;;  %v1575_v9 = vld [vmem:[#allocation4 + $0xf0] sm:$0xff] }
 0x24c   :  { %v3614_v30 = vadd.f32 %v1306_v58, %v4543_v32  ;;  %v1308_v11 = vpop.f32.mrb[21].mxu0  ;;  %1692 = vmatprep.mubr.f32.mxu1 %v5154_v12  ;;  %3365 = vmatpush1.bf16.msra.mxu1 %v3364_v8  ;;  %v1573_v8 = vld [vmem:[#allocation4 + $0xe0] sm:$0xff] }
 0x24d   :  { %v1506_v26 = vmax.f32 %v1467_v59, %v1468_v22  ;;  %v3615_v14 = vadd.f32 %v1308_v11, %v4545_v53  ;;  %3367 = vmatprep.subr.bf16.mxu1 %v3366_v44 }
 0x24e   :  { %v1469_v33 = vadd.f32 %v3614_v30, %v4608_v15 }
 0x24f   :  { %v1525_v34 = vmax.f32 %v1505_v29, %v1506_v26  ;;  %v1470_v7 = vadd.f32 %v3615_v14, %v4612_v18  ;;  %v1312_v32 = vpop.f32.mrb[22].mxu0  ;;  %v1838_v29 = vld [vmem:[#allocation4 + $0x208] sm:$0xff] }
 0x250   :  { %v3616_v20 = vadd.f32 %v1312_v32, %v4547_v54  ;;  %v1314_v35 = vpop.f32.mrb[23].mxu0  ;;  %3369 = vmatpush1.bf16.msra.mxu1 %v3368_v31  ;;  %v3378_v58 = vpack.c.bf16 %v1840_v10, %v1838_v29 }
 0x251   :  { %v4675_v28 = vmax.f32 %v1525_v34, 0.0  ;;  %v1507_v53 = vmax.f32 %v1469_v33, %v1470_v7  ;;  %v3617_v16 = vadd.f32 %v1314_v35, %v4549_v55  ;;  %3371 = vmatprep.subr.bf16.mxu1 %v3370_v27  ;;  %v3376_v55 = vpack.c.bf16 %v1575_v9, %v1573_v8 }
 0x252   :  { %v1471_v44 = vadd.f32 %v3616_v20, %v4608_v15 }
 0x253   :  { %v1472_v45 = vadd.f32 %v3617_v16, %v4612_v18  ;;  %v1318_v59 = vpop.f32.mrb[24].mxu0  ;;  %1693 = vmatmul.mubr.f32.gmra.mrb[54].mxu1 %v4675_v28 }
 0x254   :  { %v3618_v54 = vadd.f32 %v1318_v59, %v4551_v56  ;;  %v1320_v60 = vpop.f32.mrb[25].mxu0  ;;  %1698 = vmatprep.mubr.f32.mxu1 %v5154_v12  ;;  %3373 = vmatpush1.bf16.msra.mxu1 %v3372_v23 }
 0x255   :  { %v1508_v13 = vmax.f32 %v1471_v44, %v1472_v45  ;;  %v3619_v22 = vadd.f32 %v1320_v60, %v4553_v57  ;;  %3375 = vmatprep.subr.bf16.mxu1 %v3374_v25 }
 0x256   :  { %v1473_v30 = vadd.f32 %v3618_v54, %v4608_v15 }
 0x257   :  { %v1526_v11 = vmax.f32 %v1507_v53, %v1508_v13  ;;  %v1474_v31 = vadd.f32 %v3619_v22, %v4612_v18  ;;  %v1324_v26 = vpop.f32.mrb[26].mxu0 }
 0x258   :  { %v3620_v14 = vadd.f32 %v1324_v26, %v4555_v61  ;;  %v1326_v27 = vpop.f32.mrb[27].mxu0  ;;  %3377 = vmatpush1.bf16.msra.mxu1 %v3376_v55 }
 0x259   :  { %v4687_v56 = vmax.f32 %v1526_v11, 0.0  ;;  %v1509_v52 = vmax.f32 %v1473_v30, %v1474_v31  ;;  %v3621_v24 = vadd.f32 %v1326_v27, %v4557_v62  ;;  %3379 = vmatprep.subr.bf16.mxu1 %v3378_v58 }
 0x25a   :  { %v1475_v57 = vadd.f32 %v3620_v14, %v4608_v15 }
 0x25b   :  { %v1476_v33 = vadd.f32 %v3621_v24, %v4612_v18  ;;  %v1330_v17 = vpop.f32.mrb[28].mxu0  ;;  %1699 = vmatmul.mubr.f32.gmra.mrb[56].mxu1 %v4687_v56 }
 0x25c   :  { %v3622_v51 = vadd.f32 %v1330_v17, %v4559_v63  ;;  %v1332_v34 = vpop.f32.mrb[29].mxu0  ;;  %1704 = vmatprep.mubr.f32.mxu1 %v5154_v12 }
 0x25d   :  { %v1510_v61 = vmax.f32 %v1475_v57, %v1476_v33  ;;  %v3623_v7 = vadd.f32 %v1332_v34, %v4561_v1  ;;  %v1839_v34 = vld [vmem:[#allocation4 + $0x210] sm:$0xff] }
 0x25e   :  { %v1477_v32 = vadd.f32 %v3622_v51, %v4608_v15  ;;  %v1837_v51 = vld [vmem:[#allocation4 + $0x200] sm:$0xff] }
 0x25f   :  { %v1527_v20 = vmax.f32 %v1509_v52, %v1510_v61  ;;  %v1478_v62 = vadd.f32 %v3623_v7, %v4612_v18  ;;  %v1336_v35 = vpop.f32.mrb[30].mxu0  ;;  %v1842_v7 = vld [vmem:[#allocation4 + $0x228] sm:$0xff] }
 0x260   :  { %v3624_v23 = vadd.f32 %v1336_v35, %v4563_v2  ;;  %v1338_v53 = vpop.f32.mrb[31].mxu0  ;;  %v3380_v35 = vpack.c.bf16 %v1839_v34, %v1837_v51  ;;  %v5156_v34 = vld [vmem:[#allocation8_spill] sm:$0xff] }
 0x261   :  { %v4699_v16 = vmax.f32 %v1527_v20, 0.0  ;;  %v1511_v25 = vmax.f32 %v1477_v32, %v1478_v62  ;;  %v3625_v63 = vadd.f32 %v1338_v53, %v4565_v3 }
 0x262   :  { %v1479_v8 = vadd.f32 %v3624_v23, %v4608_v15  ;;  %v1533_v23 = vmax.f32 %v4625_v21, 0.0 }
 0x263   :  { %v1480_v9 = vadd.f32 %v3625_v63, %v4612_v18  ;;  %v1342_v44 = vpop.f32.mrb[32].mxu0  ;;  %1705 = vmatmul.mubr.f32.gmra.mrb[58].mxu1 %v4699_v16  ;;  %v1841_v63 = vld [vmem:[#allocation4 + $0x220] sm:$0xff] }
 0x264   :  { %v3626_v1 = vadd.f32 %v1342_v44, %v4567_v4  ;;  %v1344_v29 = vpop.f32.mrb[33].mxu0  ;;  %1710 = vmatprep.mubr.f32.mxu1 %v5154_v12  ;;  %v1846_v44 = vld [vmem:[#allocation4 + $0x248] sm:$0xff] }
 0x265   :  { %v1512_v10 = vmax.f32 %v1479_v8, %v1480_v9  ;;  %v3627_v2 = vadd.f32 %v1344_v29, %v4569_v5  ;;  %v1843_v8 = vld [vmem:[#allocation4 + $0x230] sm:$0xff] }
 0x266   :  { %v1481_v45 = vadd.f32 %v3626_v1, %v4608_v15  ;;  %v1848_v1 = vld [vmem:[#allocation4 + $0x258] sm:$0xff] }
 0x267   :  { %v1528_v59 = vmax.f32 %v1511_v25, %v1512_v10  ;;  %v1482_v3 = vadd.f32 %v3627_v2, %v4612_v18  ;;  %v1348_v54 = vpop.f32.mrb[34].mxu0 }
 0x268   :  { %v3628_v60 = vadd.f32 %v1348_v54, %v4571_v6  ;;  %v1350_v55 = vpop.f32.mrb[35].mxu0  ;;  %v1845_v54 = vld [vmem:[#allocation4 + $0x240] sm:$0xff] }
 0x269   :  { %v4711_v13 = vmax.f32 %v1528_v59, 0.0  ;;  %v1513_v22 = vmax.f32 %v1481_v45, %v1482_v3  ;;  %v3629_v4 = vadd.f32 %v1350_v55, %v4573_v37  ;;  %v3386_v3 = vpack.c.bf16 %v1848_v1, %v1846_v44  ;;  %v1861_v44 = vld [vmem:[#allocation4 + $0x2c0] sm:$0xff]  ;;  %v1863_v1 = vld [vmem:[#allocation4 + $0x2d0] sm:$0xff] }
 0x26a   :  { %v1483_v58 = vadd.f32 %v3628_v60, %v4608_v15  ;;  %v1847_v60 = vld [vmem:[#allocation4 + $0x250] sm:$0xff] }
 0x26b   :  { %v1484_v30 = vadd.f32 %v3629_v4, %v4612_v18  ;;  %v1354_v11 = vpop.f32.mrb[36].mxu0  ;;  %1711 = vmatmul.mubr.f32.gmra.mrb[60].mxu1 %v4711_v13  ;;  %v1852_v4 = vld [vmem:[#allocation4 + $0x278] sm:$0xff] }
 0x26c   :  { %v3630_v5 = vadd.f32 %v1354_v11, %v4575_v38  ;;  %v1356_v31 = vpop.f32.mrb[37].mxu0  ;;  %1716 = vmatprep.mubr.f32.mxu1 %v5154_v12 }
 0x26d   :  { %v1514_v26 = vmax.f32 %v1483_v58, %v1484_v30  ;;  %v3631_v6 = vadd.f32 %v1356_v31, %v4577_v39  ;;  %v1844_v39 = vld [vmem:[#allocation4 + $0x238] sm:$0xff] }
 0x26e   :  { %v1485_v14 = vadd.f32 %v3630_v5, %v4608_v15  ;;  %v3382_v25 = vpack.c.bf16 %v1844_v39, %v1842_v7  ;;  %v1853_v39 = vld [vmem:[#allocation4 + $0x280] sm:$0xff] }
 0x26f   :  { %v1529_v27 = vmax.f32 %v1513_v22, %v1514_v26  ;;  %v1486_v37 = vadd.f32 %v3631_v6, %v4612_v18  ;;  %v1360_v52 = vpop.f32.mrb[38].mxu0  ;;  %v1850_v22 = vld [vmem:[#allocation4 + $0x268] sm:$0xff] }
 0x270   :  { %v3632_v24 = vadd.f32 %v1360_v52, %v4579_v40  ;;  %v1362_v57 = vpop.f32.mrb[39].mxu0  ;;  %v3390_v6 = vpack.c.bf16 %v1852_v4, %v1850_v22  ;;  %v1854_v52 = vld [vmem:[#allocation4 + $0x288] sm:$0xff]  ;;  %v2001_v22 = vld [vmem:[#allocation4 + $0x310] sm:$0xff] }
 0x271   :  { %v4723_v33 = vmax.f32 %v1529_v27, 0.0  ;;  %v1515_v17 = vmax.f32 %v1485_v14, %v1486_v37  ;;  %v3633_v38 = vadd.f32 %v1362_v57, %v4581_v41  ;;  %v1849_v14 = vld [vmem:[#allocation4 + $0x260] sm:$0xff]  ;;  %v1851_v27 = vld [vmem:[#allocation4 + $0x270] sm:$0xff]  ;;  %v2004_v4 = vld [vmem:[#allocation4 + $0x328] sm:$0xff] }
 0x272   :  { %v1487_v61 = vadd.f32 %v3632_v24, %v4608_v15  ;;  %v1856_v24 = vld [vmem:[#allocation4 + $0x298] sm:$0xff] }
 0x273   :  { %v1488_v32 = vadd.f32 %v3633_v38, %v4612_v18  ;;  %v1366_v20 = vpop.f32.mrb[40].mxu0  ;;  %1717 = vmatmul.mubr.f32.gmra.mrb[62].mxu1 %v4723_v33  ;;  %v3394_v7 = vpack.c.bf16 %v1856_v24, %v1854_v52  ;;  %v2014_v52 = vld [vmem:[#allocation4 + $0x378] sm:$0xff] }
 0x274   :  { %v3634_v62 = vadd.f32 %v1366_v20, %v4583_v42  ;;  %v1368_v40 = vpop.f32.mrb[41].mxu0  ;;  %1787 = vmatprep.mubr.f32.mxu1 %v5154_v12 }
 0x275   :  { %v1516_v41 = vmax.f32 %v1487_v61, %v1488_v32  ;;  %v3635_v53 = vadd.f32 %v1368_v40, %v4585_v43  ;;  %v3384_v43 = vpack.c.bf16 %v1843_v8, %v1841_v63  ;;  %v1855_v32 = vld [vmem:[#allocation4 + $0x290] sm:$0xff]  ;;  %v1860_v40 = vld [vmem:[#allocation4 + $0x2b8] sm:$0xff]  ;;  %v1862_v63 = vld [vmem:[#allocation4 + $0x2c8] sm:$0xff] }
 0x276   :  { %v1489_v9 = vadd.f32 %v3634_v62, %v4608_v15  ;;  %v1858_v62 = vld [vmem:[#allocation4 + $0x2a8] sm:$0xff]  ;;  %v1864_v8 = vld [vmem:[#allocation4 + $0x2d8] sm:$0xff] }
 0x277   :  { %v1490_v29 = vadd.f32 %v3635_v53, %v4612_v18  ;;  %v1372_v10 = vpop.f32.mrb[42].mxu0  ;;  %1788 = vmatmul.mubr.f32.vlgmr.msra.gmra.mrb[48].mxu1 %v1533_v23  ;;  %v4735_v42 = vmax.f32 %v1515_v17, %v1516_v41  ;;  %v3398_v41 = vpack.c.bf16 %v1860_v40, %v1858_v62  ;;  %v1857_v53 = vld [vmem:[#allocation4 + $0x2a0] sm:$0xff]  ;;  %v2021_v40 = vld [vmem:[#allocation4 + $0x3b0] sm:$0xff] }
 0x278   :  { %v3636_v2 = vadd.f32 %v1372_v10, %v4587_v46  ;;  %v1374_v45 = vpop.f32.mrb[43].mxu0  ;;  %3381 = vmatpush1.bf16.msra.mxu1 %v3380_v35  ;;  %1793 = vmatprep.mubr.f32.mxu1 %v5154_v12  ;;  %v5155_v46 = vmax.f32 %v4635_v19, 0.0  ;;  %v1868_v10 = vld [vmem:[#allocation4 + $0x2f8] sm:$0xff]  ;;  %v2019_v62 = vld [vmem:[#allocation4 + $0x3a0] sm:$0xff] }
 0x279   :  { %v1517_v21 = vmax.f32 %v1489_v9, %v1490_v29  ;;  %v3637_v59 = vadd.f32 %v1374_v45, %v4589_v47  ;;  %3383 = vmatprep.subr.bf16.mxu1 %v3382_v25  ;;  %v3388_v47 = vpack.c.bf16 %v1847_v60, %v1845_v54  ;;  %v1859_v25 = vld [vmem:[#allocation4 + $0x2b0] sm:$0xff]  ;;  %v3402_v9 = vpack.c.bf16 %v1864_v8, %v1862_v63  ;;  %v1866_v29 = vld [vmem:[#allocation4 + $0x2e8] sm:$0xff]  ;;  %v2030_v8 = vld [vmem:[#allocation4 + $0x3f8] sm:$0xff] }
 0x27a   :  { %v1491_v55 = vadd.f32 %v3636_v2, %v4608_v15  ;;  %v3404_v2 = vpack.c.bf16 %v1863_v1, %v1861_v44  ;;  %v3406_v45 = vpack.c.bf16 %v1868_v10, %v1866_v29  ;;  %v2028_v63 = vld [vmem:[#allocation4 + $0x3e8] sm:$0xff]  ;;  %v2027_v44 = vld [vmem:[#allocation4 + $0x3e0] sm:$0xff]  ;;  %v2029_v1 = vld [vmem:[#allocation4 + $0x3f0] sm:$0xff] }
 0x27b   :  { %v1492_v58 = vadd.f32 %v3637_v59, %v4612_v18  ;;  %v1378_v30 = vpop.f32.mrb[44].mxu0  ;;  %1794 = vmatmul.mubr.f32.gmra.mrb[50].mxu1 %v5155_v46  ;;  %v2000_v59 = vld [vmem:[#allocation4 + $0x308] sm:$0xff]  ;;  %v2164_v10 = vld [vmem:[#allocation4 + $0x418] sm:$0xff] }
 0x27c   :  { %v3638_v11 = vadd.f32 %v1378_v30, %v4591_v48  ;;  %v1380_v5 = vpop.f32.mrb[45].mxu0  ;;  %3385 = vmatpush1.bf16.msra.mxu1 %v3384_v43  ;;  %1799 = vmatprep.mubr.f32.mxu1 %v5154_v12  ;;  %v1865_v43 = vld [vmem:[#allocation4 + $0x2e0] sm:$0xff]  ;;  %v2162_v29 = vld [vmem:[#allocation4 + $0x408] sm:$0xff] }
 0x27d   :  { %v1518_v31 = vmax.f32 %v1491_v55, %v1492_v58  ;;  %v3639_v26 = vadd.f32 %v1380_v5, %v4593_v49  ;;  %3387 = vmatprep.subr.bf16.mxu1 %v3386_v3  ;;  %v3392_v49 = vpack.c.bf16 %v1851_v27, %v1849_v14  ;;  %v2002_v3 = vld [vmem:[#allocation4 + $0x318] sm:$0xff]  ;;  %v1999_v55 = vld [vmem:[#allocation4 + $0x300] sm:$0xff]  ;;  %v2005_v5 = vld [vmem:[#allocation4 + $0x330] sm:$0xff] }
 0x27e   :  { %v1493_v37 = vadd.f32 %v3638_v11, %v4608_v15  ;;  %v3410_v60 = vpack.c.bf16 %v2002_v3, %v2000_v59  ;;  %v2006_v58 = vld [vmem:[#allocation4 + $0x338] sm:$0xff]  ;;  %v3412_v30 = vpack.c.bf16 %v2001_v22, %v1999_v55  ;;  %v2003_v11 = vld [vmem:[#allocation4 + $0x320] sm:$0xff]  ;;  %v2009_v27 = vld [vmem:[#allocation4 + $0x350] sm:$0xff] }
 0x27f   :  { %v1494_v19 = vadd.f32 %v3639_v26, %v4612_v18  ;;  %v1384_v57 = vpop.f32.mrb[46].mxu0  ;;  %1800 = vmatmul.mubr.f32.gmra.mrb[52].mxu1 %v4652_v0  ;;  %v4750_v48 = vmax.f32 %v1517_v21, %v1518_v31  ;;  %v1867_v21 = vld [vmem:[#allocation4 + $0x2f0] sm:$0xff]  ;;  %v3414_v46 = vpack.c.bf16 %v2006_v58, %v2004_v4  ;;  %v2010_v31 = vld [vmem:[#allocation4 + $0x358] sm:$0xff]  ;;  %v3416_v26 = vpack.c.bf16 %v2005_v5, %v2003_v11  ;;  %v2007_v14 = vld [vmem:[#allocation4 + $0x340] sm:$0xff] }
 0x280   :  { %v3640_v17 = vadd.f32 %v1384_v57, %v4595_v50  ;;  %v1386_v38 = vpop.f32.mrb[47].mxu0  ;;  %3389 = vmatpush1.bf16.msra.mxu1 %v3388_v47  ;;  %1805 = vmatprep.mubr.f32.mxu1 %v5154_v12  ;;  %v3396_v50 = vpack.c.bf16 %v1855_v32, %v1853_v39  ;;  %v3408_v54 = vpack.c.bf16 %v1867_v21, %v1865_v43  ;;  %v2008_v47 = vld [vmem:[#allocation4 + $0x348] sm:$0xff]  ;;  %v2011_v57 = vld [vmem:[#allocation4 + $0x360] sm:$0xff]  ;;  %v2022_v39 = vld [vmem:[#allocation4 + $0x3b8] sm:$0xff] }
 0x281   :  { %v1519_v51 = vmax.f32 %v1493_v37, %v1494_v19  ;;  %v3641_v61 = vadd.f32 %v1386_v38, %v5156_v34  ;;  %3391 = vmatprep.subr.bf16.mxu1 %v3390_v6  ;;  %v3418_v6 = vpack.c.bf16 %v2010_v31, %v2008_v47  ;;  %v2012_v37 = vld [vmem:[#allocation4 + $0x368] sm:$0xff]  ;;  %v3420_v24 = vpack.c.bf16 %v2009_v27, %v2007_v14  ;;  %v2018_v38 = vld [vmem:[#allocation4 + $0x398] sm:$0xff]  ;;  %v2015_v34 = vld [vmem:[#allocation4 + $0x380] sm:$0xff] }
 0x282   :  { %v1495_v20 = vadd.f32 %v3640_v17, %v4608_v15  ;;  %v3422_v19 = vpack.c.bf16 %v2014_v52, %v2012_v37  ;;  %v2016_v17 = vld [vmem:[#allocation4 + $0x388] sm:$0xff]  ;;  %v3442_v43 = vpack.c.bf16 %v2164_v10, %v2162_v29  ;;  %v2161_v21 = vld [vmem:[#allocation4 + $0x400] sm:$0xff]  ;;  %v2163_v59 = vld [vmem:[#allocation4 + $0x410] sm:$0xff] }
 0x283   :  { %v1496_v35 = vadd.f32 %v3641_v61, %v4612_v18  ;;  %1806 = vmatmul.mubr.f32.gmra.mrb[54].mxu1 %v4663_v36  ;;  %v3400_v18 = vpack.c.bf16 %v1859_v25, %v1857_v53  ;;  %v2017_v61 = vld [vmem:[#allocation4 + $0x390] sm:$0xff]  ;;  %v2023_v53 = vld [vmem:[#allocation4 + $0x3c0] sm:$0xff]  ;;  %v2166_v3 = vld [vmem:[#allocation4 + $0x428] sm:$0xff] }
 0x284   :  { %3393 = vmatpush1.bf16.msra.mxu1 %v3392_v49  ;;  %1811 = vmatprep.mubr.f32.mxu1 %v5154_v12  ;;  %v3428_v32 = vpack.c.bf16 %v2017_v61, %v2015_v34  ;;  %v2025_v25 = vld [vmem:[#allocation4 + $0x3d0] sm:$0xff]  ;;  %v2165_v22 = vld [vmem:[#allocation4 + $0x420] sm:$0xff]  ;;  %v2170_v58 = vld [vmem:[#allocation4 + $0x448] sm:$0xff] }
 0x285   :  { %v1520_v23 = vmax.f32 %v1495_v20, %v1496_v35  ;;  %3395 = vmatprep.subr.bf16.mxu1 %v3394_v7  ;;  %v2020_v7 = vld [vmem:[#allocation4 + $0x3a8] sm:$0xff]  ;;  %v2167_v4 = vld [vmem:[#allocation4 + $0x430] sm:$0xff]  ;;  %v2169_v11 = vld [vmem:[#allocation4 + $0x440] sm:$0xff] }
 0x286   :  { %v3430_v20 = vpack.c.bf16 %v2022_v39, %v2020_v7  ;;  %v2024_v35 = vld [vmem:[#allocation4 + $0x3c8] sm:$0xff]  ;;  %v2171_v5 = vld [vmem:[#allocation4 + $0x450] sm:$0xff]  ;;  %v2176_v31 = vld [vmem:[#allocation4 + $0x478] sm:$0xff] }
 0x287   :  { %1812 = vmatmul.mubr.f32.gmra.mrb[56].mxu1 %v4675_v28  ;;  %v4760_v15 = vmax.f32 %v1519_v51, %v1520_v23  ;;  %v3426_v51 = vpack.c.bf16 %v2018_v38, %v2016_v17  ;;  %v3432_v23 = vpack.c.bf16 %v2021_v40, %v2019_v62  ;;  %v2174_v47 = vld [vmem:[#allocation4 + $0x468] sm:$0xff]  ;;  %v2173_v14 = vld [vmem:[#allocation4 + $0x460] sm:$0xff]  ;;  %v2180_v37 = vld [vmem:[#allocation4 + $0x498] sm:$0xff] }
 0x288   :  { %3397 = vmatpush1.bf16.msra.mxu1 %v3396_v50  ;;  %1817 = vmatprep.mubr.f32.mxu1 %v5154_v12  ;;  %v2026_v50 = vld [vmem:[#allocation4 + $0x3d8] sm:$0xff]  ;;  %v2178_v27 = vld [vmem:[#allocation4 + $0x488] sm:$0xff]  ;;  %v2183_v34 = vld [vmem:[#allocation4 + $0x4b0] sm:$0xff] }
 0x289   :  { %3399 = vmatprep.subr.bf16.mxu1 %v3398_v41  ;;  %v3434_v41 = vpack.c.bf16 %v2026_v50, %v2024_v35  ;;  %v2184_v17 = vld [vmem:[#allocation4 + $0x4b8] sm:$0xff]  ;;  %v2186_v61 = vld [vmem:[#allocation4 + $0x4c8] sm:$0xff]  ;;  %v2187_v62 = vld [vmem:[#allocation4 + $0x4d0] sm:$0xff] }
 0x28a   :  { %v2188_v7 = vld [vmem:[#allocation4 + $0x4d8] sm:$0xff]  ;;  %v2190_v40 = vld [vmem:[#allocation4 + $0x4e8] sm:$0xff]  ;;  %v2958_v10 = vld [vmem:[%s5138_s5 + $0xa0] sm:$0xff] }
 0x28b   :  { %1818 = vmatmul.mubr.f32.gmra.mrb[58].mxu1 %v4687_v56  ;;  %v2192_v35 = vld [vmem:[#allocation4 + $0x4f8] sm:$0xff] }
 0x28c   :  { %3401 = vmatpush1.bf16.msra.mxu1 %v3400_v18  ;;  %1823 = vmatprep.mubr.f32.mxu1 %v5154_v12  ;;  %v3436_v18 = vpack.c.bf16 %v2025_v25, %v2023_v53  ;;  %v2191_v53 = vld [vmem:[#allocation4 + $0x4f0] sm:$0xff] }
 0x28d   :  { %3403 = vmatprep.subr.bf16.mxu1 %v3402_v9  ;;  %v3438_v9 = vpack.c.bf16 %v2030_v8, %v2028_v63  ;;  %v1543_v63 = vmax.f32 %v4750_v48, 0.0  ;;  %v2954_v8 = vld [vmem:[%s5138_s5 + $0x80] sm:$0xff]  ;;  %v2956_v48 = vld [vmem:[%s5138_s5 + $0x90] sm:$0xff] }
 0x28f   :  { %1824 = vmatmul.mubr.f32.gmra.mrb[60].mxu1 %v4699_v16 }
 0x290   :  { %3405 = vmatpush1.bf16.msra.mxu1 %v3404_v2  ;;  %1829 = vmatprep.mubr.f32.mxu1 %v5154_v12  ;;  %v3440_v2 = vpack.c.bf16 %v2029_v1, %v2027_v44  ;;  %v3912_v44 = vmov 0.0|0.0   ;;  %v2957_v1 = vld [vmem:[%s5138_s5 + $0x98] sm:$0xff] }
 0x291   :  { %3407 = vmatprep.subr.bf16.mxu1 %v3406_v45  ;;  %v4784_v45 = vmax.f32 %v4735_v42, 0.0  ;;  %v3448_v42 = vpack.c.bf16 %v2167_v4, %v2165_v22  ;;  %v3478_v29 = vpack.c.bf16 %v2957_v1, %v2956_v48  ;;  %v2968_v22 = vld [vmem:[%s5138_s5 + $0xf0] sm:$0xff]  ;;  %v2969_v4 = vld [vmem:[%s5138_s5 + $0xf8] sm:$0xff] }
 0x293   :  { %1830 = vmatmul.mubr.f32.gmra.mrb[62].mxu1 %v4711_v13 }
 0x294   :  { %3409 = vmatpush1.bf16.msra.mxu1 %v3408_v54  ;;  %1933 = vmatprep.mubr.f32.mxu1 %v5154_v12  ;;  %v2168_v54 = vld [vmem:[#allocation4 + $0x438] sm:$0xff] }
 0x295   :  { %3411 = vmatprep.subr.bf16.mxu1 %v3410_v60  ;;  %v3444_v60 = vpack.c.bf16 %v2163_v59, %v2161_v21  ;;  %v3446_v55 = vpack.c.bf16 %v2168_v54, %v2166_v3  ;;  %v2964_v21 = vld [vmem:[%s5138_s5 + $0xd0] sm:$0xff]  ;;  %v2965_v59 = vld [vmem:[%s5138_s5 + $0xd8] sm:$0xff]  ;;  %v2966_v54 = vld [vmem:[%s5138_s5 + $0xe0] sm:$0xff] }
 0x296   :  { %v3490_v3 = vpack.c.bf16 %v2965_v59, %v2964_v21 }
 0x297   :  { %1934 = vmatmul.mubr.f32.vlgmr.msra.gmra.mrb[48].mxu1 %v4652_v0  ;;  %v2013_v0 = vld [vmem:[#allocation4 + $0x370] sm:$0xff] }
 0x298   :  { %3413 = vmatpush1.bf16.msra.mxu1 %v3412_v30  ;;  %1939 = vmatprep.mubr.f32.mxu1 %v5154_v12  ;;  %v3424_v49 = vpack.c.bf16 %v2013_v0, %v2011_v57  ;;  %v2172_v30 = vld [vmem:[#allocation4 + $0x458] sm:$0xff]  ;;  %v2179_v57 = vld [vmem:[#allocation4 + $0x490] sm:$0xff]  ;;  %v2182_v0 = vld [vmem:[#allocation4 + $0x4a8] sm:$0xff] }
 0x299   :  { %3415 = vmatprep.subr.bf16.mxu1 %v3414_v46  ;;  %v3450_v46 = vpack.c.bf16 %v2172_v30, %v2170_v58  ;;  %v3496_v58 = vpack.c.bf16 %v2969_v4, %v2968_v22  ;;  %v2322_v30 = vld [vmem:[%s5137_s4] sm:$0x3] }
 0x29b   :  { %1940 = vmatmul.mubr.f32.gmra.mrb[50].mxu1 %v4663_v36 }
 0x29c   :  { %3417 = vmatpush1.bf16.msra.mxu1 %v3416_v26  ;;  %1945 = vmatprep.mubr.f32.mxu1 %v5154_v12  ;;  %v3452_v26 = vpack.c.bf16 %v2171_v5, %v2169_v11 }
 0x29d   :  { %3419 = vmatprep.subr.bf16.mxu1 %v3418_v6  ;;  %v3454_v6 = vpack.c.bf16 %v2176_v31, %v2174_v47 }
 0x29f   :  { %1946 = vmatmul.mubr.f32.gmra.mrb[52].mxu1 %v4675_v28 }
 0x2a0   :  { %3421 = vmatpush1.bf16.msra.mxu1 %v3420_v24  ;;  %1951 = vmatprep.mubr.f32.mxu1 %v5154_v12  ;;  %v3458_v24 = vpack.c.bf16 %v2180_v37, %v2178_v27 }
 0x2a1   :  { %3423 = vmatprep.subr.bf16.mxu1 %v3422_v19  ;;  %v2177_v19 = vld [vmem:[#allocation4 + $0x480] sm:$0xff] }
 0x2a2   :  { %v3460_v38 = vpack.c.bf16 %v2179_v57, %v2177_v19 }
 0x2a3   :  { %1952 = vmatmul.mubr.f32.gmra.mrb[54].mxu1 %v4687_v56 }
 0x2a4   :  { %3425 = vmatpush1.bf16.msra.mxu1 %v3424_v49  ;;  %1957 = vmatprep.mubr.f32.mxu1 %v5154_v12  ;;  %v3462_v49 = vpack.c.bf16 %v2184_v17, %v2182_v0 }
 0x2a5   :  { %3427 = vmatprep.subr.bf16.mxu1 %v3426_v51  ;;  %v2181_v51 = vld [vmem:[#allocation4 + $0x4a0] sm:$0xff] }
 0x2a6   :  { %v3464_v39 = vpack.c.bf16 %v2183_v34, %v2181_v51 }
 0x2a7   :  { %1958 = vmatmul.mubr.f32.gmra.mrb[56].mxu1 %v4699_v16 }
 0x2a8   :  { %3429 = vmatpush1.bf16.msra.mxu1 %v3428_v32  ;;  %1963 = vmatprep.mubr.f32.mxu1 %v5154_v12  ;;  %v3466_v32 = vpack.c.bf16 %v2188_v7, %v2186_v61 }
 0x2a9   :  { %3431 = vmatprep.subr.bf16.mxu1 %v3430_v20  ;;  %v2185_v20 = vld [vmem:[#allocation4 + $0x4c0] sm:$0xff] }
 0x2aa   :  { %v3468_v50 = vpack.c.bf16 %v2187_v62, %v2185_v20  ;;  %v2366_v62 = vld [vmem:[%s5138_s5] sm:$0xff] }
 0x2ab   :  { %1964 = vmatmul.mubr.f32.gmra.mrb[58].mxu1 %v4711_v13 }
 0x2ac   :  { %3433 = vmatpush1.bf16.msra.mxu1 %v3432_v23  ;;  %1969 = vmatprep.mubr.f32.mxu1 %v5154_v12  ;;  %v3470_v23 = vpack.c.bf16 %v2192_v35, %v2190_v40  ;;  %v2367_v40 = vld [vmem:[%s5138_s5 + $0x8] sm:$0xff] }
 0x2ad   :  { %3435 = vmatprep.subr.bf16.mxu1 %v3434_v41  ;;  %v2189_v41 = vld [vmem:[#allocation4 + $0x4e0] sm:$0xff] }
 0x2ae   :  { %v3472_v25 = vpack.c.bf16 %v2191_v53, %v2189_v41  ;;  %v3499_v53 = vpack.c.bf16 %v2367_v40, %v2366_v62  ;;  %v2980_v40 = vld [vmem:[%s5138_s5 + $0x150] sm:$0xff] }
 0x2af   :  { %1970 = vmatmul.mubr.f32.gmra.mrb[60].mxu1 %v4723_v33 }
 0x2b0   :  { %3437 = vmatpush1.bf16.msra.mxu1 %v3436_v18  ;;  %1975 = vmatprep.mubr.f32.mxu1 %v5154_v12  ;;  %v2955_v18 = vld [vmem:[%s5138_s5 + $0x88] sm:$0xff] }
 0x2b1   :  { %3439 = vmatprep.subr.bf16.mxu1 %v3438_v9  ;;  %v3475_v9 = vpack.c.bf16 %v2955_v18, %v2954_v8  ;;  %v2368_v18 = vld [vmem:[%s5138_s5 + $0x10] sm:$0xff] }
 0x2b3   :  { %1976 = vmatmul.mubr.f32.gmra.mrb[62].mxu1 %v4784_v45 }
 0x2b4   :  { %3441 = vmatpush1.bf16.msra.mxu1 %v3440_v2  ;;  %2095 = vmatprep.mubr.f32.mxu1 %v5154_v12  ;;  %v2959_v2 = vld [vmem:[%s5138_s5 + $0xa8] sm:$0xff] }
 0x2b5   :  { %3443 = vmatprep.subr.bf16.mxu1 %v3442_v43 }
 0x2b7   :  { %2096 = vmatmul.mubr.f32.vlgmr.msra.gmra.mrb[48].mxu1 %v4663_v36  ;;  %v2175_v36 = vld [vmem:[#allocation4 + $0x470] sm:$0xff] }
 0x2b8   :  { %3445 = vmatpush1.bf16.msra.mxu1 %v3444_v60  ;;  %2101 = vmatprep.mubr.f32.mxu1 %v5154_v12  ;;  %v3456_v52 = vpack.c.bf16 %v2175_v36, %v2173_v14  ;;  %v2967_v60 = vld [vmem:[%s5138_s5 + $0xe8] sm:$0xff] }
 0x2b9   :  { %3447 = vmatprep.subr.bf16.mxu1 %v3446_v55  ;;  %v3493_v55 = vpack.c.bf16 %v2967_v60, %v2966_v54  ;;  %v2373_v54 = vld [vmem:[%s5138_s5 + $0x38] sm:$0xff] }
 0x2bb   :  { %2102 = vmatmul.mubr.f32.gmra.mrb[50].mxu1 %v4675_v28 }
 0x2bc   :  { %3449 = vmatpush1.bf16.msra.mxu1 %v3448_v42  ;;  %2107 = vmatprep.mubr.f32.mxu1 %v5154_v12  ;;  %v5157_v42 = vld [vmem:[#allocation9_spill] sm:$0xff] }
 0x2bd   :  { %3451 = vmatprep.subr.bf16.mxu1 %v3450_v46  ;;  %v5158_v46 = vsub.s32 0, %v5157_v42  ;;  %v5159_v5 = vsub.s32 1, %v5157_v42  ;;  %v2375_v42 = vld [vmem:[%s5138_s5 + $0x48] sm:$0xff] }
 0x2bf   :  { %2108 = vmatmul.mubr.f32.gmra.mrb[52].mxu1 %v4687_v56  ;;  %v2327_v11 = vrot.slane %v2322_v30, %v5158_v46  ;;  %v2331_v47 = vrot.slane %v2322_v30, %v5159_v5  ;;  %v2374_v30 = vld [vmem:[%s5138_s5 + $0x40] sm:$0xff] }
 0x2c0   :  { %3453 = vmatpush1.bf16.msra.mxu1 %v3452_v26  ;;  %2113 = vmatprep.mubr.f32.mxu1 %v5154_v12  ;;  %v3511_v5 = vpack.c.bf16 %v2375_v42, %v2374_v30 }
 0x2c1   :  { %3455 = vmatprep.subr.bf16.mxu1 %v3454_v6 }
 0x2c3   :  { %2114 = vmatmul.mubr.f32.gmra.mrb[54].mxu1 %v4699_v16 }
 0x2c4   :  { %3457 = vmatpush1.bf16.msra.mxu1 %v3456_v52  ;;  %2119 = vmatprep.mubr.f32.mxu1 %v5154_v12 }
 0x2c5   :  { %3459 = vmatprep.subr.bf16.mxu1 %v3458_v24 }
 0x2c7   :  { %2120 = vmatmul.mubr.f32.gmra.mrb[56].mxu1 %v4711_v13 }
 0x2c8   :  { %3461 = vmatpush1.bf16.msra.mxu1 %v3460_v38  ;;  %2125 = vmatprep.mubr.f32.mxu1 %v5154_v12 }
 0x2c9   :  { %3463 = vmatprep.subr.bf16.mxu1 %v3462_v49 }
 0x2cb   :  { %2126 = vmatmul.mubr.f32.gmra.mrb[58].mxu1 %v4723_v33 }
 0x2cc   :  { %3465 = vmatpush1.bf16.msra.mxu1 %v3464_v39  ;;  %2131 = vmatprep.mubr.f32.mxu1 %v5154_v12 }
 0x2cd   :  { %3467 = vmatprep.subr.bf16.mxu1 %v3466_v32 }
 0x2cf   :  { %2132 = vmatmul.mubr.f32.gmra.mrb[60].mxu1 %v4784_v45 }
 0x2d0   :  { %3469 = vmatpush1.bf16.msra.mxu1 %v3468_v50  ;;  %2137 = vmatprep.mubr.f32.mxu1 %v5154_v12 }
 0x2d1   :  { %3471 = vmatprep.subr.bf16.mxu1 %v3470_v23 }
 0x2d3   :  { %2138 = vmatmul.mubr.f32.gmra.mrb[62].mxu1 %v1543_v63 }
 0x2d4   :  { %3473 = vmatpush1.bf16.msra.mxu1 %v3472_v25  ;;  %2257 = vmatprep.mubr.f32.mxu1 %v5154_v12 }
 0x2d5   :  { %3474 = vmatprep.subr.bf16.mxu1 %v3912_v44 }
 0x2d7   :  { %2258 = vmatmul.mubr.f32.vlgmr.msra.gmra.mrb[48].mxu1 %v4675_v28  ;;  %v3481_v28 = vpack.c.bf16 %v2959_v2, %v2958_v10 }
 0x2d8   :  { %2263 = vmatprep.mubr.f32.mxu1 %v5154_v12  ;;  %3476 = vmatpush3.bf16.msra.mxu1 %v3475_v9  ;;  %v2369_v9 = vld [vmem:[%s5138_s5 + $0x18] sm:$0xff] }
 0x2d9   :  { %3477 = vmatprep.subr.bf16.mxu1 %v3912_v44  ;;  %v3502_v10 = vpack.c.bf16 %v2369_v9, %v2368_v18  ;;  %v2986_v18 = vld [vmem:[%s5138_s5 + $0x180] sm:$0xff]  ;;  %v2987_v9 = vld [vmem:[%s5138_s5 + $0x188] sm:$0xff] }
 0x2db   :  { %2264 = vmatmul.mubr.f32.gmra.mrb[50].mxu1 %v4687_v56  ;;  %v1544_v56 = vmax.f32 %v4760_v15, 0.0  ;;  %v2963_v15 = vld [vmem:[%s5138_s5 + $0xc8] sm:$0xff] }
 0x2dc   :  { %2269 = vmatprep.mubr.f32.mxu1 %v5154_v12  ;;  %3479 = vmatpush3.bf16.msra.mxu1 %v3478_v29 }
 0x2dd   :  { %3480 = vmatprep.subr.bf16.mxu1 %v3912_v44 }
 0x2df   :  { %2270 = vmatmul.mubr.f32.gmra.mrb[52].mxu1 %v4699_v16  ;;  %v2960_v16 = vld [vmem:[%s5138_s5 + $0xb0] sm:$0xff] }
 0x2e0   :  { %2275 = vmatprep.mubr.f32.mxu1 %v5154_v12  ;;  %3482 = vmatpush3.bf16.msra.mxu1 %v3481_v28 }
 0x2e1   :  { %3483 = vmatprep.subr.bf16.mxu1 %v3912_v44 }
 0x2e3   :  { %2276 = vmatmul.mubr.f32.gmra.mrb[54].mxu1 %v4711_v13  ;;  %v2961_v13 = vld [vmem:[%s5138_s5 + $0xb8] sm:$0xff] }
 0x2e4   :  { %2281 = vmatprep.mubr.f32.mxu1 %v5154_v12 }
 0x2e7   :  { %2282 = vmatmul.mubr.f32.gmra.mrb[56].mxu1 %v4723_v33  ;;  %v3484_v33 = vpack.c.bf16 %v2961_v13, %v2960_v16  ;;  %v2371_v16 = vld [vmem:[%s5138_s5 + $0x28] sm:$0xff] }
 0x2e8   :  { %2287 = vmatprep.mubr.f32.mxu1 %v5154_v12 }
 0x2e9   :  { %3485 = vmatpush3.bf16.msra.mxu1 %v3484_v33 }
 0x2ea   :  { %3486 = vmatprep.subr.bf16.mxu1 %v3912_v44 }
 0x2eb   :  { %2288 = vmatmul.mubr.f32.gmra.mrb[58].mxu1 %v4784_v45  ;;  %v2962_v45 = vld [vmem:[%s5138_s5 + $0xc0] sm:$0xff] }
 0x2ec   :  { %2293 = vmatprep.mubr.f32.mxu1 %v5154_v12  ;;  %v3487_v43 = vpack.c.bf16 %v2963_v15, %v2962_v45 }
 0x2ee   :  { %3488 = vmatpush3.bf16.msra.mxu1 %v3487_v43 }
 0x2ef   :  { %2294 = vmatmul.mubr.f32.gmra.mrb[60].mxu1 %v1543_v63  ;;  %3489 = vmatprep.subr.bf16.mxu1 %v3912_v44 }
 0x2f0   :  { %2299 = vmatprep.mubr.f32.mxu1 %v5154_v12 }
 0x2f2   :  { %3491 = vmatpush3.bf16.msra.mxu1 %v3490_v3  ;;  %v2372_v3 = vld [vmem:[%s5138_s5 + $0x30] sm:$0xff] }
 0x2f3   :  { %2300 = vmatmul.mubr.f32.gmra.mrb[62].mxu1 %v1544_v56  ;;  %3492 = vmatprep.subr.bf16.mxu1 %v3912_v44  ;;  %v2370_v56 = vld [vmem:[%s5138_s5 + $0x20] sm:$0xff]  ;;  %v3508_v4 = vpack.c.bf16 %v2373_v54, %v2372_v3  ;;  %v2997_v3 = vld [vmem:[%s5138_s5 + $0x1d8] sm:$0xff] }
 0x2f4   :  { %3121 = vmatprep.mubr.msk.f32.mxu1 %vm3913_vm4, %v5154_v12  ;;  %v3505_v43 = vpack.c.bf16 %v2371_v16, %v2370_v56  ;;  %v2991_v56 = vld [vmem:[%s5138_s5 + $0x1a8] sm:$0xff] }
 0x2f6   :  { %3494 = vmatpush3.bf16.msra.mxu1 %v3493_v55 }
 0x2f7   :  { %3495 = vmatprep.subr.bf16.mxu1 %v3912_v44 }
 0x2fa   :  { %3497 = vmatpush3.bf16.msra.mxu1 %v3496_v58 }
 0x2fb   :  { %3498 = vmatprep.subr.bf16.mxu1 %v3912_v44 }
 0x3aa   :  { %v2259_v31 = vpop.f32.mrb[48].mxu1 }
 0x3ab   :  { %v2334_v26 = vadd.f32 %v2327_v11, %v2259_v31  ;;  %v2261_v6 = vpop.f32.mrb[49].mxu1 }
 0x3ac   :  { %v2335_v14 = vadd.f32 %v2331_v47, %v2261_v6  ;;  %v2379_v6 = vld [vmem:[%s5138_s5 + $0x68] sm:$0xff] }
 0x3ae   :  { %v2350_v36 = vmax.f32 %v2334_v26, %v2335_v14  ;;  %v2265_v27 = vpop.f32.mrb[50].mxu1  ;;  %v2378_v26 = vld [vmem:[%s5138_s5 + $0x60] sm:$0xff] }
 0x3af   :  { %v2336_v37 = vadd.f32 %v2327_v11, %v2265_v27  ;;  %v2267_v52 = vpop.f32.mrb[51].mxu1  ;;  %v3517_v14 = vpack.c.bf16 %v2379_v6, %v2378_v26  ;;  %v2381_v27 = vld [vmem:[%s5138_s5 + $0x78] sm:$0xff]  ;;  %v2729_v6 = vld [vmem:[%s5140_s7 + $0x28] sm:$0xff] }
 0x3b0   :  { %v2337_v24 = vadd.f32 %v2331_v47, %v2267_v52  ;;  %v2970_v52 = vld [vmem:[%s5138_s5 + $0x100] sm:$0xff] }
 0x3b2   :  { %v2351_v19 = vmax.f32 %v2336_v37, %v2337_v24  ;;  %v2271_v57 = vpop.f32.mrb[52].mxu1  ;;  %v2971_v24 = vld [vmem:[%s5138_s5 + $0x108] sm:$0xff] }
 0x3b3   :  { %v2338_v0 = vadd.f32 %v2327_v11, %v2271_v57  ;;  %v2273_v17 = vpop.f32.mrb[53].mxu1 }
 0x3b4   :  { %v4884_v38 = vmax.f32 %v2350_v36, %v2351_v19  ;;  %v2339_v49 = vadd.f32 %v2331_v47, %v2273_v17  ;;  %v2380_v36 = vld [vmem:[%s5138_s5 + $0x70] sm:$0xff]  ;;  %v3523_v19 = vpack.c.bf16 %v2971_v24, %v2970_v52  ;;  %v2973_v17 = vld [vmem:[%s5138_s5 + $0x118] sm:$0xff]  ;;  %v2732_v52 = vld [vmem:[%s5140_s7 + $0x40] sm:$0xff] }
 0x3b5   :  { %v3520_v37 = vpack.c.bf16 %v2381_v27, %v2380_v36  ;;  %v2730_v36 = vld [vmem:[%s5140_s7 + $0x30] sm:$0xff]  ;;  %v2731_v27 = vld [vmem:[%s5140_s7 + $0x38] sm:$0xff]  ;;  %v2733_v24 = vld [vmem:[%s5140_s7 + $0x48] sm:$0xff] }
 0x3b6   :  { %v2352_v51 = vmax.f32 %v2338_v0, %v2339_v49  ;;  %v2277_v34 = vpop.f32.mrb[54].mxu1  ;;  %v2362_v57 = vmax.f32 %v4884_v38, 0.0  ;;  %v2972_v0 = vld [vmem:[%s5138_s5 + $0x110] sm:$0xff]  ;;  %v2974_v38 = vld [vmem:[%s5138_s5 + $0x120] sm:$0xff] }
 0x3b7   :  { %v2340_v61 = vadd.f32 %v2327_v11, %v2277_v34  ;;  %v2279_v7 = vpop.f32.mrb[55].mxu1  ;;  %v3526_v49 = vpack.c.bf16 %v2973_v17, %v2972_v0  ;;  %v2735_v0 = vld [vmem:[%s5140_s7 + $0x58] sm:$0xff] }
 0x3b8   :  { %v2341_v39 = vadd.f32 %v2331_v47, %v2279_v7  ;;  %v2977_v7 = vld [vmem:[%s5138_s5 + $0x138] sm:$0xff] }
 0x3ba   :  { %v2353_v32 = vmax.f32 %v2340_v61, %v2341_v39  ;;  %v2283_v20 = vpop.f32.mrb[56].mxu1  ;;  %v2976_v61 = vld [vmem:[%s5138_s5 + $0x130] sm:$0xff] }
 0x3bb   :  { %v2342_v35 = vadd.f32 %v2327_v11, %v2283_v20  ;;  %v2285_v50 = vpop.f32.mrb[57].mxu1  ;;  %v3532_v39 = vpack.c.bf16 %v2977_v7, %v2976_v61  ;;  %v2979_v20 = vld [vmem:[%s5138_s5 + $0x148] sm:$0xff]  ;;  %v2739_v61 = vld [vmem:[%s5140_s7 + $0x78] sm:$0xff] }
 0x3bc   :  { %v2359_v23 = vmax.f32 %v2352_v51, %v2353_v32  ;;  %v2343_v41 = vadd.f32 %v2331_v47, %v2285_v50  ;;  %v2975_v51 = vld [vmem:[%s5138_s5 + $0x128] sm:$0xff]  ;;  %v2978_v32 = vld [vmem:[%s5138_s5 + $0x140] sm:$0xff] }
 0x3bd   :  { %v3529_v34 = vpack.c.bf16 %v2975_v51, %v2974_v38  ;;  %v3535_v62 = vpack.c.bf16 %v2979_v20, %v2978_v32  ;;  %v2737_v38 = vld [vmem:[%s5140_s7 + $0x68] sm:$0xff] }
 0x3be   :  { %v2363_v25 = vmax.f32 %v2359_v23, 0.0  ;;  %v2354_v63 = vmax.f32 %v2342_v35, %v2343_v41  ;;  %v2289_v8 = vpop.f32.mrb[58].mxu1  ;;  %v2981_v35 = vld [vmem:[%s5138_s5 + $0x158] sm:$0xff]  ;;  %v2982_v23 = vld [vmem:[%s5138_s5 + $0x160] sm:$0xff]  ;;  %v2983_v41 = vld [vmem:[%s5138_s5 + $0x168] sm:$0xff] }
 0x3bf   :  { %v2344_v48 = vadd.f32 %v2327_v11, %v2289_v8  ;;  %v2291_v1 = vpop.f32.mrb[59].mxu1  ;;  %v3538_v50 = vpack.c.bf16 %v2981_v35, %v2980_v40 }
 0x3c0   :  { %v2345_v29 = vadd.f32 %v2331_v47, %v2291_v1  ;;  %3122 = vmatmul.mubr.f32.vlgmr.msra.gmra.mrb[64].mxu1 %v2363_v25  ;;  %v2984_v25 = vld [vmem:[%s5138_s5 + $0x170] sm:$0xff] }
 0x3c1   :  { %3500 = vmatpush3.bf16.msra.mxu1 %v3499_v53  ;;  %3156 = vmatprep.mubr.msk.f32.mxu1 %vm3913_vm4, %v5154_v12  ;;  %v3541_v53 = vpack.c.bf16 %v2983_v41, %v2982_v23 }
 0x3c2   :  { %v2355_v2 = vmax.f32 %v2344_v48, %v2345_v29  ;;  %v2295_v28 = vpop.f32.mrb[60].mxu1  ;;  %3501 = vmatprep.subr.bf16.mxu1 %v3912_v44  ;;  %v3547_v48 = vpack.c.bf16 %v2987_v9, %v2986_v18  ;;  %v2988_v29 = vld [vmem:[%s5138_s5 + $0x190] sm:$0xff]  ;;  %v3003_v18 = vld [vmem:[%s5141_s8] ss:$0 sm:$0xff] }
 0x3c3   :  { %v2346_v13 = vadd.f32 %v2327_v11, %v2295_v28  ;;  %v2297_v33 = vpop.f32.mrb[61].mxu1  ;;  %v2990_v28 = vld [vmem:[%s5138_s5 + $0x1a0] sm:$0xff] }
 0x3c4   :  { %v4907_v45 = vmax.f32 %v2354_v63, %v2355_v2  ;;  %v2347_v15 = vadd.f32 %v2331_v47, %v2297_v33  ;;  %v2985_v63 = vld [vmem:[%s5138_s5 + $0x178] sm:$0xff]  ;;  %v3553_v16 = vpack.c.bf16 %v2991_v56, %v2990_v28 }
 0x3c5   :  { %3503 = vmatpush3.bf16.msra.mxu1 %v3502_v10  ;;  %v3544_v8 = vpack.c.bf16 %v2985_v63, %v2984_v25  ;;  %v2989_v10 = vld [vmem:[%s5138_s5 + $0x198] sm:$0xff] }
 0x3c6   :  { %v2356_v21 = vmax.f32 %v2346_v13, %v2347_v15  ;;  %v2301_v59 = vpop.f32.mrb[62].mxu1  ;;  %3504 = vmatprep.subr.bf16.mxu1 %v3912_v44  ;;  %v2364_v1 = vmax.f32 %v4907_v45, 0.0  ;;  %v3550_v2 = vpack.c.bf16 %v2989_v10, %v2988_v29  ;;  %v2992_v13 = vld [vmem:[%s5138_s5 + $0x1b0] sm:$0xff]  ;;  %v2993_v33 = vld [vmem:[%s5138_s5 + $0x1b8] sm:$0xff]  ;;  %v2994_v15 = vld [vmem:[%s5138_s5 + $0x1c0] sm:$0xff] }
 0x3c7   :  { %v2348_v60 = vadd.f32 %v2327_v11, %v2301_v59  ;;  %v2303_v55 = vpop.f32.mrb[63].mxu1  ;;  %v2376_v11 = vld [vmem:[%s5138_s5 + $0x50] sm:$0xff]  ;;  %v3556_v45 = vpack.c.bf16 %v2993_v33, %v2992_v13 }
 0x3c8   :  { %v2349_v22 = vadd.f32 %v2331_v47, %v2303_v55  ;;  %v2377_v47 = vld [vmem:[%s5138_s5 + $0x58] sm:$0xff]  ;;  %v2996_v59 = vld [vmem:[%s5138_s5 + $0x1d0] sm:$0xff]  ;;  %v2999_v55 = vld [vmem:[%s5138_s5 + $0x1e8] sm:$0xff] }
 0x3c9   :  { %3506 = vmatpush3.bf16.msra.mxu1 %v3505_v43  ;;  %v3514_v31 = vpack.c.bf16 %v2377_v47, %v2376_v11  ;;  %v2995_v43 = vld [vmem:[%s5138_s5 + $0x1c8] sm:$0xff]  ;;  %v3562_v54 = vpack.c.bf16 %v2997_v3, %v2996_v59  ;;  %v2726_v47 = vld [vmem:[%s5140_s7 + $0x10] sm:$0xff] }
 0x3ca   :  { %v2357_v58 = vmax.f32 %v2348_v60, %v2349_v22  ;;  %3507 = vmatprep.subr.bf16.mxu1 %v3912_v44  ;;  %v2998_v60 = vld [vmem:[%s5138_s5 + $0x1e0] sm:$0xff]  ;;  %v2725_v11 = vld [vmem:[%s5140_s7 + $0x8] sm:$0xff] }
 0x3cb   :  { %v3565_v22 = vpack.c.bf16 %v2999_v55, %v2998_v60 }
 0x3cc   :  { %v4923_v46 = vmax.f32 %v2356_v21, %v2357_v58  ;;  %v3559_v21 = vpack.c.bf16 %v2995_v43, %v2994_v15  ;;  %v3001_v58 = vld [vmem:[%s5138_s5 + $0x1f8] sm:$0xff] }
 0x3cd   :  { %3509 = vmatpush3.bf16.msra.mxu1 %v3508_v4  ;;  %v3000_v4 = vld [vmem:[%s5138_s5 + $0x1f0] sm:$0xff] }
 0x3ce   :  { %3510 = vmatprep.subr.bf16.mxu1 %v3912_v44  ;;  %v3568_v30 = vpack.c.bf16 %v3001_v58, %v3000_v4  ;;  %v2365_v42 = vmax.f32 %v4923_v46, 0.0  ;;  %v2727_v46 = vld [vmem:[%s5140_s7 + $0x18] sm:$0xff] }
 0x3cf   :  { %v3574_v26 = vpack.c.bf16 %v2727_v46, %v2726_v47 }
 0x3d1   :  { %3512 = vmatpush3.bf16.msra.mxu1 %v3511_v5  ;;  %v2724_v5 = vld [vmem:[%s5140_s7] sm:$0xff] }
 0x3d2   :  { %3513 = vmatprep.subr.bf16.mxu1 %v3912_v44 }
 0x3d5   :  { %3515 = vmatpush3.bf16.msra.mxu1 %v3514_v31  ;;  %v3571_v31 = vpack.c.bf16 %v2725_v11, %v2724_v5 }
 0x3d6   :  { %3516 = vmatprep.subr.bf16.mxu1 %v3912_v44 }
 0x3d9   :  { %3518 = vmatpush3.bf16.msra.mxu1 %v3517_v14 }
 0x3da   :  { %3519 = vmatprep.subr.bf16.mxu1 %v3912_v44 }
 0x3dd   :  { %3521 = vmatpush3.bf16.msra.mxu1 %v3520_v37  ;;  %v3580_v37 = vpack.c.bf16 %v2731_v27, %v2730_v36 }
 0x3de   :  { %3522 = vmatprep.subr.bf16.mxu1 %v3912_v44 }
 0x3e0   :  { %3157 = vmatmul.mubr.f32.vlgmr.msra.gmra.mrb[66].mxu1 %v2362_v57  ;;  %v2734_v57 = vld [vmem:[%s5140_s7 + $0x50] sm:$0xff] }
 0x3e1   :  { %3524 = vmatpush3.bf16.msra.mxu1 %v3523_v19  ;;  %3191 = vmatprep.mubr.msk.f32.mxu1 %vm3913_vm4, %v5154_v12  ;;  %v3583_v19 = vpack.c.bf16 %v2733_v24, %v2732_v52  ;;  %v3586_v17 = vpack.c.bf16 %v2735_v0, %v2734_v57 }
 0x3e2   :  { %3525 = vmatprep.subr.bf16.mxu1 %v3912_v44 }
 0x3e5   :  { %3527 = vmatpush3.bf16.msra.mxu1 %v3526_v49  ;;  %v2736_v49 = vld [vmem:[%s5140_s7 + $0x60] sm:$0xff] }
 0x3e6   :  { %3528 = vmatprep.subr.bf16.mxu1 %v3912_v44  ;;  %v3589_v51 = vpack.c.bf16 %v2737_v38, %v2736_v49 }
 0x3e9   :  { %3530 = vmatpush3.bf16.msra.mxu1 %v3529_v34  ;;  %v2738_v34 = vld [vmem:[%s5140_s7 + $0x70] sm:$0xff] }
 0x3ea   :  { %3531 = vmatprep.subr.bf16.mxu1 %v3912_v44  ;;  %v3592_v7 = vpack.c.bf16 %v2739_v61, %v2738_v34 }
 0x3ed   :  { %3533 = vmatpush3.bf16.msra.mxu1 %v3532_v39 }
 0x3ee   :  { %3534 = vmatprep.subr.bf16.mxu1 %v3912_v44 }
 0x3f1   :  { %3536 = vmatpush3.bf16.msra.mxu1 %v3535_v62 }
 0x3f2   :  { %3537 = vmatprep.subr.bf16.mxu1 %v3912_v44 }
 0x3f5   :  { %3539 = vmatpush3.bf16.msra.mxu1 %v3538_v50 }
 0x3f6   :  { %3540 = vmatprep.subr.bf16.mxu1 %v3912_v44 }
 0x3f9   :  { %3542 = vmatpush3.bf16.msra.mxu1 %v3541_v53 }
 0x3fa   :  { %3543 = vmatprep.subr.bf16.mxu1 %v3912_v44 }
 0x3fd   :  { %3545 = vmatpush3.bf16.msra.mxu1 %v3544_v8 }
 0x3fe   :  { %3546 = vmatprep.subr.bf16.mxu1 %v3912_v44 }
 0x400   :  { %3192 = vmatmul.mubr.f32.vlgmr.msra.gmra.mrb[68].mxu1 %v2364_v1 }
 0x401   :  { %3548 = vmatpush3.bf16.msra.mxu1 %v3547_v48  ;;  %3226 = vmatprep.mubr.msk.f32.mxu1 %vm3913_vm4, %v5154_v12 }
 0x402   :  { %3549 = vmatprep.subr.bf16.mxu1 %v3912_v44 }
 0x405   :  { %3551 = vmatpush3.bf16.msra.mxu1 %v3550_v2 }
 0x406   :  { %3552 = vmatprep.subr.bf16.mxu1 %v3912_v44 }
 0x409   :  { %3554 = vmatpush3.bf16.msra.mxu1 %v3553_v16 }
 0x40a   :  { %3555 = vmatprep.subr.bf16.mxu1 %v3912_v44 }
 0x40d   :  { %3557 = vmatpush3.bf16.msra.mxu1 %v3556_v45 }
 0x40e   :  { %3558 = vmatprep.subr.bf16.mxu1 %v3912_v44 }
 0x411   :  { %3560 = vmatpush3.bf16.msra.mxu1 %v3559_v21 }
 0x412   :  { %3561 = vmatprep.subr.bf16.mxu1 %v3912_v44 }
 0x415   :  { %3563 = vmatpush3.bf16.msra.mxu1 %v3562_v54 }
 0x416   :  { %3564 = vmatprep.subr.bf16.mxu1 %v3912_v44 }
 0x419   :  { %3566 = vmatpush3.bf16.msra.mxu1 %v3565_v22 }
 0x41a   :  { %3567 = vmatprep.subr.bf16.mxu1 %v3912_v44 }
 0x41d   :  { %3569 = vmatpush3.bf16.msra.mxu1 %v3568_v30 }
 0x41e   :  { %3570 = vmatprep.subr.bf16.mxu1 %v3912_v44 }
 0x420   :  { %3227 = vmatmul.mubr.f32.vlgmr.msra.gmra.mrb[70].mxu1 %v2365_v42 }
 0x421   :  { %3261 = vmatprep.mubr.msk.f32.mxu1 %vm3913_vm4, %v5154_v12  ;;  %3572 = vmatpush3.bf16.msra.mxu1 %v3571_v31  ;;  %v2728_v12 = vld [vmem:[%s5140_s7 + $0x20] sm:$0xff] }
 0x422   :  { %3573 = vmatprep.subr.bf16.mxu1 %v3912_v44  ;;  %v3577_v14 = vpack.c.bf16 %v2729_v6, %v2728_v12 }
 0x425   :  { %3575 = vmatpush3.bf16.msra.mxu1 %v3574_v26 }
 0x426   :  { %3576 = vmatprep.subr.bf16.mxu1 %v3912_v44 }
 0x429   :  { %3578 = vmatpush3.bf16.msra.mxu1 %v3577_v14 }
 0x42a   :  { %3579 = vmatprep.subr.bf16.mxu1 %v3912_v44 }
 0x42d   :  { %3581 = vmatpush3.bf16.msra.mxu1 %v3580_v37 }
 0x42e   :  { %3582 = vmatprep.subr.bf16.mxu1 %v3912_v44 }
 0x431   :  { %3584 = vmatpush3.bf16.msra.mxu1 %v3583_v19 }
 0x432   :  { %3585 = vmatprep.subr.bf16.mxu1 %v3912_v44 }
 0x435   :  { %3587 = vmatpush3.bf16.msra.mxu1 %v3586_v17 }
 0x436   :  { %3588 = vmatprep.subr.bf16.mxu1 %v3912_v44 }
 0x439   :  { %3590 = vmatpush3.bf16.msra.mxu1 %v3589_v51 }
 0x43a   :  { %3591 = vmatprep.subr.bf16.mxu1 %v3912_v44  ;;  %v3002_v44 = vld [vmem:[%s5139_s6] ss:$0 sm:$0xff] }
 0x43d   :  { %3593 = vmatpush3.bf16.msra.mxu1 %v3592_v7 }
 0x493   :  { %v2465_v39 = vpop.f32.mrb[64].mxu1 }
 0x494   :  { %v3123_v32 = vpop.f32.mrb[65].mxu1 }
 0x4b3   :  { %v2535_v20 = vpop.f32.mrb[66].mxu1 }
 0x4b4   :  { %v2536_v62 = vadd.f32 %v2535_v20, %v2465_v39  ;;  %v3158_v40 = vpop.f32.mrb[67].mxu1 }
 0x4d3   :  { %v2622_v35 = vpop.f32.mrb[68].mxu1 }
 0x4d4   :  { %v2626_v50 = vadd.f32 %v2622_v35, %v2536_v62  ;;  %v3193_v23 = vpop.f32.mrb[69].mxu1 }
 0x4f3   :  { %v2710_v41 = vpop.f32.mrb[70].mxu1 }
 0x4f4   :  { %v2714_v53 = vadd.f32 %v2710_v41, %v2626_v50  ;;  %v3228_v25 = vpop.f32.mrb[71].mxu1 }
 0x4f6   :  { %v2722_v63 = vadd.f32 %v3002_v44, %v2714_v53 }
 0x4f8   :  { %v2723_v8 = vmax.f32 %v2722_v63, 0.0 }
 0x4fa   :  { %3262 = vmatmul.mubr.f32.vlgmr.msra.gmra.mrb[72].mxu1 %v2723_v8 }
 0x5cd   :  { %v2813_v9 = vpop.f32.mrb[72].mxu1 }
 0x5ce   :  { %v2814_v48 = vadd.f32 %v3003_v18, %v2813_v9  ;;  %v3263_v1 = vpop.f32.mrb[73].mxu1 }
 0x5d0   :  { %2817 = vst [vmem:[%s5142_s9] sm:$0xff] %v2814_v48 }
 0x5d1   :  { %2822 = vsyncpa [#allocation3], 1 }
 0x5d2   :  { %2823 = vsyncpa [#allocation5], 1 }

</bundles_post_ra>
